<compile_context>
chip_gen: v6e
topology: v6e:2x2x1
jax: 0.10.0
libtpu: 0.0.40
codegen_flags: <defaults>
</compile_context>

<pallas_src>
import functools
import numpy as np

import jax
import jax.numpy as jnp
from jax import lax
from jax.experimental import pallas as pl
from jax.experimental.pallas import tpu as pltpu

# ----------------------------- model config ---------------------------------
DIM = 32
N_LAYERS = 2
N_HEADS = 4
N_KV_HEADS = 2
HEAD_DIM = DIM // N_HEADS          # 8
KV_DIM = N_KV_HEADS * HEAD_DIM     # 16
GROUP = N_HEADS // N_KV_HEADS      # 2
VOCAB = 64
MULTIPLE_OF = 16
FFN_DIM_MULTIPLIER = 2.0
NORM_EPS = 1e-5
ROPE_THETA = 10000.0
SEQ = 8


def _ffn_hidden_dim(dim):
    hidden = int(dim * FFN_DIM_MULTIPLIER)
    return MULTIPLE_OF * ((hidden + MULTIPLE_OF - 1) // MULTIPLE_OF)


HIDDEN = _ffn_hidden_dim(DIM)      # 64


# ------------------------------ fused kernel ---------------------------------
def _fwd_kernel(toks_ref, emb_ref, norms_ref, rope_ref,
                wqkvr_ref, wo_ref, w13_ref, w2_ref, outw_ref,
                tok_ref,
                *, n_layers, n_heads, n_kv_heads, head_dim, hidden,
                eps, scale, vocab):
    S = toks_ref.shape[0]
    V, D = emb_ref.shape
    kvd = n_kv_heads * head_dim
    group = n_heads // n_kv_heads

    def rmsnorm(x_bf16, w_1xd):
        xf = x_bf16.astype(jnp.float32)
        ms = jnp.mean(xf * xf, axis=-1, keepdims=True)
        y = xf * lax.rsqrt(ms + eps) * w_1xd.astype(jnp.float32)
        return y.astype(jnp.bfloat16)

    # ---- embedding lookup fused as a one-hot MXU matmul (exact: one-hot rows
    # pick single bf16 embedding entries) -------------------------------------
    toks = toks_ref[...]                                    # (S, 1) int32
    vids = lax.broadcasted_iota(jnp.int32, (S, V), 1)
    onehot = jnp.where(vids == toks, 1.0, 0.0).astype(jnp.bfloat16)
    h = jnp.dot(onehot, emb_ref[...],
                preferred_element_type=jnp.float32).astype(jnp.bfloat16)

    # causal mask (torch: triu(-inf, diagonal=1) added to scores)
    row = lax.broadcasted_iota(jnp.int32, (S, S), 0)
    col = lax.broadcasted_iota(jnp.int32, (S, S), 1)
    causal = (col <= row)[None, :, :]                       # (1, S, S)

    norms = norms_ref[...]                                  # (2L+1, D) bf16
    cos = rope_ref[0]                                       # (S, D) f32
    sin = rope_ref[1]                                       # (S, D) f32
    cos_k = cos[:, :kvd]
    sin_k = sin[:, :kvd]

    for l in range(n_layers):
        # --------------------------- attention -----------------------------
        xn = rmsnorm(h, norms[l:l + 1, :])                  # (S, D) bf16
        # One fused projection: [q | k | v | q_swapped | k_swapped]  (S, 112)
        proj = jnp.dot(xn, wqkvr_ref[l], preferred_element_type=jnp.float32)
        q = proj[:, 0:D]
        k = proj[:, D:D + kvd]
        v = proj[:, D + kvd:D + 2 * kvd]
        qs = proj[:, D + 2 * kvd:2 * D + 2 * kvd]
        ks = proj[:, 2 * D + 2 * kvd:2 * D + 3 * kvd]

        # interleaved RoPE; the (a,b)->(-b,a) pair swap is pre-folded into the
        # qs/ks weight columns, so this is pure element-wise f32 math.
        qr = (q * cos + qs * sin).astype(jnp.bfloat16)      # (S, D)
        kr = (k * cos_k + ks * sin_k).astype(jnp.bfloat16)  # (S, kvd)
        vb = v.astype(jnp.bfloat16)                         # (S, kvd)

        # batched GQA attention over all heads at once
        q3 = jnp.stack([qr[:, hh * head_dim:(hh + 1) * head_dim]
                        for hh in range(n_heads)], axis=0)               # (H,S,hd)
        k3 = jnp.stack([kr[:, (hh // group) * head_dim:((hh // group) + 1) * head_dim]
                        for hh in range(n_heads)], axis=0)               # (H,S,hd)
        v3 = jnp.stack([vb[:, (hh // group) * head_dim:((hh // group) + 1) * head_dim]
                        for hh in range(n_heads)], axis=0)               # (H,S,hd)

        s = jnp.einsum('hqd,hkd->hqk', q3, k3,
                       preferred_element_type=jnp.float32) * scale      # (H,S,S)
        s = jnp.where(causal, s, -jnp.inf)
        mx = jnp.max(s, axis=-1, keepdims=True)
        p = jnp.exp(s - mx)
        denom = jnp.sum(p, axis=-1, keepdims=True)
        p = (p * pl.reciprocal(denom, approx=True)).astype(jnp.bfloat16)
        o3 = jnp.einsum('hqk,hkd->hqd', p, v3,
                        preferred_element_type=jnp.float32)              # (H,S,hd)

        attn = jnp.concatenate([o3[hh] for hh in range(n_heads)],
                               axis=-1).astype(jnp.bfloat16)             # (S, D)
        delta = jnp.dot(attn, wo_ref[l], preferred_element_type=jnp.float32)
        h = (h.astype(jnp.float32) + delta).astype(jnp.bfloat16)

        # --------------------------- feed forward ---------------------------
        hn = rmsnorm(h, norms[n_layers + l:n_layers + l + 1, :])
        a13 = jnp.dot(hn, w13_ref[l], preferred_element_type=jnp.float32)  # (S, 2H)
        a1 = a13[:, :hidden]
        a3 = a13[:, hidden:]
        g = a1 * pl.reciprocal(1.0 + jnp.exp(-a1), approx=True)            # silu
        mid = (g * a3).astype(jnp.bfloat16)
        ffn = jnp.dot(mid, w2_ref[l], preferred_element_type=jnp.float32)  # (S, D)
        h = (h.astype(jnp.float32) + ffn).astype(jnp.bfloat16)

    # ---------------------- final norm + logits + argmax ---------------------
    hn = rmsnorm(h, norms[2 * n_layers:2 * n_layers + 1, :])
    last = hn[S - 1:S, :]                                    # (1, D) bf16
    logits = jnp.dot(last, outw_ref[...],
                     preferred_element_type=jnp.float32)     # (1, V) f32
    m = jnp.max(logits, axis=-1, keepdims=True)
    vcol = lax.broadcasted_iota(jnp.int32, logits.shape, 1).astype(jnp.float32)
    # first index attaining the max (matches torch/jnp argmax tie-break);
    # synthetic weights never produce NaNs here.
    idx = jnp.min(jnp.where(logits == m, vcol, float(vocab)),
                  axis=-1, keepdims=True)                    # (1, 1) f32
    tok_ref[...] = idx.astype(jnp.int32)


def fused_forward(toks_col, params):
    kernel = functools.partial(
        _fwd_kernel,
        n_layers=N_LAYERS, n_heads=N_HEADS, n_kv_heads=N_KV_HEADS,
        head_dim=HEAD_DIM, hidden=HIDDEN, eps=NORM_EPS,
        scale=1.0 / (HEAD_DIM ** 0.5), vocab=VOCAB)
    out = pl.pallas_call(
        kernel,
        out_shape=jax.ShapeDtypeStruct((1, 1), jnp.int32),
        compiler_params=pltpu.CompilerParams(vmem_limit_bytes=32 * 1024 * 1024),
    )(toks_col, params["emb"], params["norms"], params["rope"],
      params["wqkvr"], params["wo"], params["w13"], params["w2"], params["outw"])
    return out[0, 0]


# ------------------------------ parameter init ------------------------------
def _rope_swap_cols(w_t):
    """Given w_t (in, out) with interleaved RoPE pairs along `out`, build w so
    that (x @ w) equals the signed pair-swap of (x @ w_t):
        col 2i   -> -w_t[:, 2i+1]      (partner of even gets -sin later)
        col 2i+1 -> +w_t[:, 2i]        (partner of odd  gets +sin later)
    """
    r = w_t.reshape(w_t.shape[0], -1, 2)
    return jnp.stack([-r[..., 1], r[..., 0]], axis=-1).reshape(w_t.shape)


def init_params(key):
    def mat(k, shape, s=0.05):
        return s * jax.random.normal(k, shape, dtype=jnp.float32)

    def norm_w(k, dim):
        return 1.0 + 0.1 * jax.random.normal(k, (dim,), dtype=jnp.float32)

    n_keys = 3 + N_LAYERS * 9
    keys = iter(jax.random.split(key, n_keys))

    tok_emb = mat(next(keys), (VOCAB, DIM), s=0.1)
    final_norm = norm_w(next(keys), DIM)
    out_w = mat(next(keys), (VOCAB, DIM))

    attn_norms, ffn_norms = [], []
    wqkvr, wo_t, w13_t, w2_t = [], [], [], []
    for _ in range(N_LAYERS):
        attn_norms.append(norm_w(next(keys), DIM))
        ffn_norms.append(norm_w(next(keys), DIM))
        wq = mat(next(keys), (N_HEADS * HEAD_DIM, DIM))     # (D, D)   out,in
        wk = mat(next(keys), (KV_DIM, DIM))                 # (KVD, D)
        wv = mat(next(keys), (KV_DIM, DIM))                 # (KVD, D)
        wo = mat(next(keys), (DIM, N_HEADS * HEAD_DIM))     # (D, D)
        w1 = mat(next(keys), (HIDDEN, DIM))                 # (H, D)
        w2 = mat(next(keys), (DIM, HIDDEN))                 # (D, H)
        w3 = mat(next(keys), (HIDDEN, DIM))                 # (H, D)

        wq_t, wk_t, wv_t = wq.T, wk.T, wv.T                 # (in, out) layout
        # fused [q | k | v | q_swap | k_swap] projection: (D, 112)
        wqkvr.append(jnp.concatenate(
            [wq_t, wk_t, wv_t, _rope_swap_cols(wq_t), _rope_swap_cols(wk_t)],
            axis=-1))
        wo_t.append(wo.T)                                   # (D, D)
        w13_t.append(jnp.concatenate([w1.T, w3.T], axis=-1))  # (D, 2H)
        w2_t.append(w2.T)                                   # (H, D)

    norms = jnp.stack(attn_norms + ffn_norms + [final_norm], axis=0)  # (2L+1, D)

    # RoPE tables (interleaved, per-token angle, tiled across heads), packed
    # as one (2, S, D) array: [0] = cos, [1] = sin.  K uses the first KVD cols.
    num_parts = HEAD_DIM // 2
    zero_to_one = np.arange(num_parts, dtype=np.float64) / num_parts
    freqs = 1.0 / ROPE_THETA ** zero_to_one
    angles = np.outer(np.arange(SEQ, dtype=np.float64), freqs)        # (S, hd/2)
    cos_il = np.repeat(np.cos(angles), 2, axis=-1)                    # (S, hd)
    sin_il = np.repeat(np.sin(angles), 2, axis=-1)
    rope = np.stack([np.tile(cos_il, (1, N_HEADS)),
                     np.tile(sin_il, (1, N_HEADS))], axis=0).astype(np.float32)

    bf = lambda x: x.astype(jnp.bfloat16)
    return {
        "emb": bf(tok_emb),                   # (V, D)
        "norms": bf(norms),                   # (2L+1, D)
        "rope": jnp.asarray(rope),            # (2, S, D) f32
        "wqkvr": bf(jnp.stack(wqkvr)),        # (L, D, 112)
        "wo": bf(jnp.stack(wo_t)),            # (L, D, D)
        "w13": bf(jnp.stack(w13_t)),          # (L, D, 2H)
        "w2": bf(jnp.stack(w2_t)),            # (L, H, D)
        "outw": bf(out_w.T),                  # (D, V)
    }


# ------------------------------- forward pass --------------------------------
def transformer_forward(tokens, params):
    # embedding gather, all transformer layers, final norm, logits and argmax
    # are all inside the single fused kernel.
    toks_col = tokens.reshape(-1, 1).astype(jnp.int32)      # (S, 1)
    return fused_forward(toks_col, params)                  # scalar int32


# --------------------------------- driver ------------------------------------
if __name__ == "__main__":
    key = jax.random.PRNGKey(0)
    pkey, tkey = jax.random.split(key)
    params = init_params(pkey)
    tokens = jax.random.randint(tkey, (SEQ,), 0, VOCAB, dtype=jnp.int32)

    next_token = jax.jit(transformer_forward)(tokens, params)
    jax.block_until_ready(next_token)
    print("KERNEL_OK")
</pallas_src>

<mosaic_0001>
module attributes {stable_mosaic.version = 11 : i64} {
  func.func @_fwd_kernel(%arg0: memref<8x1xi32, #tpu.memory_space<vmem>>, %arg1: memref<64x32xbf16, #tpu.memory_space<vmem>>, %arg2: memref<5x32xbf16, #tpu.memory_space<vmem>>, %arg3: memref<2x8x32xf32, #tpu.memory_space<vmem>>, %arg4: memref<2x32x112xbf16, #tpu.memory_space<vmem>>, %arg5: memref<2x32x32xbf16, #tpu.memory_space<vmem>>, %arg6: memref<2x32x128xbf16, #tpu.memory_space<vmem>>, %arg7: memref<2x64x32xbf16, #tpu.memory_space<vmem>>, %arg8: memref<32x64xbf16, #tpu.memory_space<vmem>>, %arg9: memref<1x1xi32, #tpu.memory_space<vmem>>) attributes {dimension_semantics = [], scalar_prefetch = 0 : i64, scratch_operands = 0 : i64, tpu.core_type = #tpu.core_type<tc>} {
    %c0 = arith.constant 0 : index
    %c0_0 = arith.constant 0 : index
    %0 = vector.load %arg0[%c0, %c0_0] : memref<8x1xi32, #tpu.memory_space<vmem>>, vector<8x1xi32>
    %1 = tpu.iota {dimensions = array<i32: 1>} : vector<8x64xi32>
    %2 = vector.broadcast %0 : vector<8x1xi32> to vector<8x64xi32>
    %3 = arith.cmpi eq, %1, %2 : vector<8x64xi32>
    %cst = arith.constant 1.000000e+00 : f32
    %cst_1 = arith.constant 0.000000e+00 : f32
    %4 = vector.broadcast %cst : f32 to vector<8x64xf32>
    %5 = vector.broadcast %cst_1 : f32 to vector<8x64xf32>
    %6 = arith.select %3, %4, %5 : vector<8x64xi1>, vector<8x64xf32>
    %7 = arith.truncf %6 : vector<8x64xf32> to vector<8x64xbf16>
    %c0_2 = arith.constant 0 : index
    %c0_3 = arith.constant 0 : index
    %8 = vector.load %arg1[%c0_2, %c0_3] : memref<64x32xbf16, #tpu.memory_space<vmem>>, vector<64x32xbf16>
    %cst_4 = arith.constant dense<0.000000e+00> : vector<8x32xf32>
    %9 = tpu.matmul %7, %8, %cst_4 {dimension_numbers = #tpu.dot_dimension_numbers<[1], [0], [0], [1], [0, 0, 1, 1], [], []>} : vector<8x64xbf16>, vector<64x32xbf16>, vector<8x32xf32> -> vector<8x32xf32>
    %10 = arith.truncf %9 : vector<8x32xf32> to vector<8x32xbf16>
    %11 = tpu.iota {dimensions = array<i32: 0>} : vector<8x8xi32>
    %12 = tpu.iota {dimensions = array<i32: 1>} : vector<8x8xi32>
    %13 = arith.cmpi sle, %12, %11 : vector<8x8xi32>
    %14 = vector.shape_cast %13 : vector<8x8xi1> to vector<1x8x8xi1>
    %c0_5 = arith.constant 0 : index
    %c0_6 = arith.constant 0 : index
    %15 = vector.load %arg2[%c0_5, %c0_6] : memref<5x32xbf16, #tpu.memory_space<vmem>>, vector<5x32xbf16>
    %c0_7 = arith.constant 0 : index
    %c0_8 = arith.constant 0 : index
    %c0_9 = arith.constant 0 : index
    %16 = vector.load %arg3[%c0_7, %c0_8, %c0_9] : memref<2x8x32xf32, #tpu.memory_space<vmem>>, vector<1x8x32xf32>
    %17 = vector.shape_cast %16 : vector<1x8x32xf32> to vector<8x32xf32>
    %c1 = arith.constant 1 : index
    %c0_10 = arith.constant 0 : index
    %c0_11 = arith.constant 0 : index
    %18 = vector.load %arg3[%c1, %c0_10, %c0_11] : memref<2x8x32xf32, #tpu.memory_space<vmem>>, vector<1x8x32xf32>
    %19 = vector.shape_cast %18 : vector<1x8x32xf32> to vector<8x32xf32>
    %20 = vector.extract_strided_slice %17 {offsets = [0, 0], sizes = [8, 16], strides = [1, 1]} : vector<8x32xf32> to vector<8x16xf32>
    %21 = vector.extract_strided_slice %19 {offsets = [0, 0], sizes = [8, 16], strides = [1, 1]} : vector<8x32xf32> to vector<8x16xf32>
    %22 = vector.extract_strided_slice %15 {offsets = [0, 0], sizes = [1, 32], strides = [1, 1]} : vector<5x32xbf16> to vector<1x32xbf16>
    %23 = arith.extf %10 : vector<8x32xbf16> to vector<8x32xf32>
    %24 = arith.mulf %23, %23 : vector<8x32xf32>
    %cst_12 = arith.constant dense<0.000000e+00> : vector<8xf32>
    %25 = vector.multi_reduction <add>, %24, %cst_12 [1] : vector<8x32xf32> to vector<8xf32>
    %26 = vector.shape_cast %25 : vector<8xf32> to vector<8x1xf32>
    %cst_13 = arith.constant 3.200000e+01 : f32
    %27 = vector.broadcast %cst_13 : f32 to vector<8x1xf32>
    %28 = arith.divf %26, %27 : vector<8x1xf32>
    %cst_14 = arith.constant 9.99999974E-6 : f32
    %29 = vector.broadcast %cst_14 : f32 to vector<8x1xf32>
    %30 = arith.addf %28, %29 : vector<8x1xf32>
    %31 = math.rsqrt %30 : vector<8x1xf32>
    %32 = vector.broadcast %31 : vector<8x1xf32> to vector<8x32xf32>
    %33 = arith.mulf %23, %32 : vector<8x32xf32>
    %34 = arith.extf %22 : vector<1x32xbf16> to vector<1x32xf32>
    %35 = vector.broadcast %34 : vector<1x32xf32> to vector<8x32xf32>
    %36 = arith.mulf %33, %35 : vector<8x32xf32>
    %37 = arith.truncf %36 : vector<8x32xf32> to vector<8x32xbf16>
    %c0_15 = arith.constant 0 : index
    %c0_16 = arith.constant 0 : index
    %c0_17 = arith.constant 0 : index
    %38 = vector.load %arg4[%c0_15, %c0_16, %c0_17] : memref<2x32x112xbf16, #tpu.memory_space<vmem>>, vector<1x32x112xbf16>
    %39 = vector.shape_cast %38 : vector<1x32x112xbf16> to vector<32x112xbf16>
    %cst_18 = arith.constant dense<0.000000e+00> : vector<8x112xf32>
    %40 = tpu.matmul %37, %39, %cst_18 {dimension_numbers = #tpu.dot_dimension_numbers<[1], [0], [0], [1], [0, 0, 1, 1], [], []>} : vector<8x32xbf16>, vector<32x112xbf16>, vector<8x112xf32> -> vector<8x112xf32>
    %41 = vector.extract_strided_slice %40 {offsets = [0, 0], sizes = [8, 32], strides = [1, 1]} : vector<8x112xf32> to vector<8x32xf32>
    %42 = vector.extract_strided_slice %40 {offsets = [0, 32], sizes = [8, 16], strides = [1, 1]} : vector<8x112xf32> to vector<8x16xf32>
    %43 = vector.extract_strided_slice %40 {offsets = [0, 48], sizes = [8, 16], strides = [1, 1]} : vector<8x112xf32> to vector<8x16xf32>
    %44 = vector.extract_strided_slice %40 {offsets = [0, 64], sizes = [8, 32], strides = [1, 1]} : vector<8x112xf32> to vector<8x32xf32>
    %45 = vector.extract_strided_slice %40 {offsets = [0, 96], sizes = [8, 16], strides = [1, 1]} : vector<8x112xf32> to vector<8x16xf32>
    %46 = arith.mulf %41, %17 : vector<8x32xf32>
    %47 = arith.mulf %44, %19 : vector<8x32xf32>
    %48 = arith.addf %46, %47 : vector<8x32xf32>
    %49 = arith.truncf %48 : vector<8x32xf32> to vector<8x32xbf16>
    %50 = arith.mulf %42, %20 : vector<8x16xf32>
    %51 = arith.mulf %45, %21 : vector<8x16xf32>
    %52 = arith.addf %50, %51 : vector<8x16xf32>
    %53 = arith.truncf %52 : vector<8x16xf32> to vector<8x16xbf16>
    %54 = arith.truncf %43 : vector<8x16xf32> to vector<8x16xbf16>
    %55 = vector.extract_strided_slice %49 {offsets = [0, 0], sizes = [8, 8], strides = [1, 1]} : vector<8x32xbf16> to vector<8x8xbf16>
    %56 = vector.extract_strided_slice %49 {offsets = [0, 8], sizes = [8, 8], strides = [1, 1]} : vector<8x32xbf16> to vector<8x8xbf16>
    %57 = vector.extract_strided_slice %49 {offsets = [0, 16], sizes = [8, 8], strides = [1, 1]} : vector<8x32xbf16> to vector<8x8xbf16>
    %58 = vector.extract_strided_slice %49 {offsets = [0, 24], sizes = [8, 8], strides = [1, 1]} : vector<8x32xbf16> to vector<8x8xbf16>
    %59 = vector.shape_cast %55 : vector<8x8xbf16> to vector<1x8x8xbf16>
    %60 = vector.shape_cast %56 : vector<8x8xbf16> to vector<1x8x8xbf16>
    %61 = vector.shape_cast %57 : vector<8x8xbf16> to vector<1x8x8xbf16>
    %62 = vector.shape_cast %58 : vector<8x8xbf16> to vector<1x8x8xbf16>
    %63 = tpu.concatenate %59, %60, %61, %62 in 0 : vector<1x8x8xbf16>, vector<1x8x8xbf16>, vector<1x8x8xbf16>, vector<1x8x8xbf16> -> vector<4x8x8xbf16>
    %64 = vector.extract_strided_slice %53 {offsets = [0, 0], sizes = [8, 8], strides = [1, 1]} : vector<8x16xbf16> to vector<8x8xbf16>
    %65 = vector.extract_strided_slice %53 {offsets = [0, 0], sizes = [8, 8], strides = [1, 1]} : vector<8x16xbf16> to vector<8x8xbf16>
    %66 = vector.extract_strided_slice %53 {offsets = [0, 8], sizes = [8, 8], strides = [1, 1]} : vector<8x16xbf16> to vector<8x8xbf16>
    %67 = vector.extract_strided_slice %53 {offsets = [0, 8], sizes = [8, 8], strides = [1, 1]} : vector<8x16xbf16> to vector<8x8xbf16>
    %68 = vector.shape_cast %64 : vector<8x8xbf16> to vector<1x8x8xbf16>
    %69 = vector.shape_cast %65 : vector<8x8xbf16> to vector<1x8x8xbf16>
    %70 = vector.shape_cast %66 : vector<8x8xbf16> to vector<1x8x8xbf16>
    %71 = vector.shape_cast %67 : vector<8x8xbf16> to vector<1x8x8xbf16>
    %72 = tpu.concatenate %68, %69, %70, %71 in 0 : vector<1x8x8xbf16>, vector<1x8x8xbf16>, vector<1x8x8xbf16>, vector<1x8x8xbf16> -> vector<4x8x8xbf16>
    %73 = vector.extract_strided_slice %54 {offsets = [0, 0], sizes = [8, 8], strides = [1, 1]} : vector<8x16xbf16> to vector<8x8xbf16>
    %74 = vector.extract_strided_slice %54 {offsets = [0, 0], sizes = [8, 8], strides = [1, 1]} : vector<8x16xbf16> to vector<8x8xbf16>
    %75 = vector.extract_strided_slice %54 {offsets = [0, 8], sizes = [8, 8], strides = [1, 1]} : vector<8x16xbf16> to vector<8x8xbf16>
    %76 = vector.extract_strided_slice %54 {offsets = [0, 8], sizes = [8, 8], strides = [1, 1]} : vector<8x16xbf16> to vector<8x8xbf16>
    %77 = vector.shape_cast %73 : vector<8x8xbf16> to vector<1x8x8xbf16>
    %78 = vector.shape_cast %74 : vector<8x8xbf16> to vector<1x8x8xbf16>
    %79 = vector.shape_cast %75 : vector<8x8xbf16> to vector<1x8x8xbf16>
    %80 = vector.shape_cast %76 : vector<8x8xbf16> to vector<1x8x8xbf16>
    %81 = tpu.concatenate %77, %78, %79, %80 in 0 : vector<1x8x8xbf16>, vector<1x8x8xbf16>, vector<1x8x8xbf16>, vector<1x8x8xbf16> -> vector<4x8x8xbf16>
    "tpu.trace_start"() <{level = 10 : i32, message = "hqd,hkd->hqk"}> : () -> ()
    %cst_19 = arith.constant dense<0.000000e+00> : vector<4x8x8xf32>
    %82 = tpu.matmul %63, %72, %cst_19 {dimension_numbers = #tpu.dot_dimension_numbers<[2], [2], [1], [1], [0, 0, 0, 1, 1, 1], [0], [0]>} : vector<4x8x8xbf16>, vector<4x8x8xbf16>, vector<4x8x8xf32> -> vector<4x8x8xf32>
    "tpu.trace_stop"() : () -> ()
    %cst_20 = arith.constant 0.353553385 : f32
    %83 = vector.broadcast %cst_20 : f32 to vector<4x8x8xf32>
    %84 = arith.mulf %82, %83 : vector<4x8x8xf32>
    %cst_21 = arith.constant 0xFF800000 : f32
    %85 = vector.shape_cast %14 : vector<1x8x8xi1> to vector<1x8x8xi1>
    %86 = vector.broadcast %85 : vector<1x8x8xi1> to vector<4x8x8xi1>
    %87 = vector.broadcast %cst_21 : f32 to vector<4x8x8xf32>
    %88 = arith.select %86, %84, %87 : vector<4x8x8xi1>, vector<4x8x8xf32>
    %cst_22 = arith.constant dense<0xFF800000> : vector<4x8xf32>
    %89 = vector.multi_reduction <maximumf>, %88, %cst_22 [2] : vector<4x8x8xf32> to vector<4x8xf32>
    %90 = vector.shape_cast %89 : vector<4x8xf32> to vector<4x8x1xf32>
    %91 = vector.broadcast %90 : vector<4x8x1xf32> to vector<4x8x8xf32>
    %92 = arith.subf %88, %91 : vector<4x8x8xf32>
    %93 = math.exp %92 : vector<4x8x8xf32>
    %cst_23 = arith.constant dense<0.000000e+00> : vector<4x8xf32>
    %94 = vector.multi_reduction <add>, %93, %cst_23 [2] : vector<4x8x8xf32> to vector<4x8xf32>
    %95 = vector.shape_cast %94 : vector<4x8xf32> to vector<4x8x1xf32>
    %96 = tpu.reciprocal %95 {approx = true} : vector<4x8x1xf32> -> vector<4x8x1xf32>
    %97 = vector.broadcast %96 : vector<4x8x1xf32> to vector<4x8x8xf32>
    %98 = arith.mulf %93, %97 : vector<4x8x8xf32>
    %99 = arith.truncf %98 : vector<4x8x8xf32> to vector<4x8x8xbf16>
    "tpu.trace_start"() <{level = 10 : i32, message = "hqk,hkd->hqd"}> : () -> ()
    %cst_24 = arith.constant dense<0.000000e+00> : vector<4x8x8xf32>
    %100 = tpu.matmul %99, %81, %cst_24 {dimension_numbers = #tpu.dot_dimension_numbers<[2], [1], [1], [2], [0, 0, 0, 1, 1, 2], [0], [0]>} : vector<4x8x8xbf16>, vector<4x8x8xbf16>, vector<4x8x8xf32> -> vector<4x8x8xf32>
    "tpu.trace_stop"() : () -> ()
    %101 = vector.extract_strided_slice %100 {offsets = [0, 0, 0], sizes = [1, 8, 8], strides = [1, 1, 1]} : vector<4x8x8xf32> to vector<1x8x8xf32>
    %102 = vector.shape_cast %101 : vector<1x8x8xf32> to vector<8x8xf32>
    %103 = vector.extract_strided_slice %100 {offsets = [1, 0, 0], sizes = [1, 8, 8], strides = [1, 1, 1]} : vector<4x8x8xf32> to vector<1x8x8xf32>
    %104 = vector.shape_cast %103 : vector<1x8x8xf32> to vector<8x8xf32>
    %105 = vector.extract_strided_slice %100 {offsets = [2, 0, 0], sizes = [1, 8, 8], strides = [1, 1, 1]} : vector<4x8x8xf32> to vector<1x8x8xf32>
    %106 = vector.shape_cast %105 : vector<1x8x8xf32> to vector<8x8xf32>
    %107 = vector.extract_strided_slice %100 {offsets = [3, 0, 0], sizes = [1, 8, 8], strides = [1, 1, 1]} : vector<4x8x8xf32> to vector<1x8x8xf32>
    %108 = vector.shape_cast %107 : vector<1x8x8xf32> to vector<8x8xf32>
    %109 = tpu.concatenate %102, %104, %106, %108 in 1 : vector<8x8xf32>, vector<8x8xf32>, vector<8x8xf32>, vector<8x8xf32> -> vector<8x32xf32>
    %110 = arith.truncf %109 : vector<8x32xf32> to vector<8x32xbf16>
    %c0_25 = arith.constant 0 : index
    %c0_26 = arith.constant 0 : index
    %c0_27 = arith.constant 0 : index
    %111 = vector.load %arg5[%c0_25, %c0_26, %c0_27] : memref<2x32x32xbf16, #tpu.memory_space<vmem>>, vector<1x32x32xbf16>
    %112 = vector.shape_cast %111 : vector<1x32x32xbf16> to vector<32x32xbf16>
    %cst_28 = arith.constant dense<0.000000e+00> : vector<8x32xf32>
    %113 = tpu.matmul %110, %112, %cst_28 {dimension_numbers = #tpu.dot_dimension_numbers<[1], [0], [0], [1], [0, 0, 1, 1], [], []>} : vector<8x32xbf16>, vector<32x32xbf16>, vector<8x32xf32> -> vector<8x32xf32>
    %114 = arith.extf %10 : vector<8x32xbf16> to vector<8x32xf32>
    %115 = arith.addf %114, %113 : vector<8x32xf32>
    %116 = arith.truncf %115 : vector<8x32xf32> to vector<8x32xbf16>
    %117 = vector.extract_strided_slice %15 {offsets = [2, 0], sizes = [1, 32], strides = [1, 1]} : vector<5x32xbf16> to vector<1x32xbf16>
    %118 = arith.extf %116 : vector<8x32xbf16> to vector<8x32xf32>
    %119 = arith.mulf %118, %118 : vector<8x32xf32>
    %cst_29 = arith.constant dense<0.000000e+00> : vector<8xf32>
    %120 = vector.multi_reduction <add>, %119, %cst_29 [1] : vector<8x32xf32> to vector<8xf32>
    %121 = vector.shape_cast %120 : vector<8xf32> to vector<8x1xf32>
    %cst_30 = arith.constant 3.200000e+01 : f32
    %122 = vector.broadcast %cst_30 : f32 to vector<8x1xf32>
    %123 = arith.divf %121, %122 : vector<8x1xf32>
    %cst_31 = arith.constant 9.99999974E-6 : f32
    %124 = vector.broadcast %cst_31 : f32 to vector<8x1xf32>
    %125 = arith.addf %123, %124 : vector<8x1xf32>
    %126 = math.rsqrt %125 : vector<8x1xf32>
    %127 = vector.broadcast %126 : vector<8x1xf32> to vector<8x32xf32>
    %128 = arith.mulf %118, %127 : vector<8x32xf32>
    %129 = arith.extf %117 : vector<1x32xbf16> to vector<1x32xf32>
    %130 = vector.broadcast %129 : vector<1x32xf32> to vector<8x32xf32>
    %131 = arith.mulf %128, %130 : vector<8x32xf32>
    %132 = arith.truncf %131 : vector<8x32xf32> to vector<8x32xbf16>
    %c0_32 = arith.constant 0 : index
    %c0_33 = arith.constant 0 : index
    %c0_34 = arith.constant 0 : index
    %133 = vector.load %arg6[%c0_32, %c0_33, %c0_34] : memref<2x32x128xbf16, #tpu.memory_space<vmem>>, vector<1x32x128xbf16>
    %134 = vector.shape_cast %133 : vector<1x32x128xbf16> to vector<32x128xbf16>
    %cst_35 = arith.constant dense<0.000000e+00> : vector<8x128xf32>
    %135 = tpu.matmul %132, %134, %cst_35 {dimension_numbers = #tpu.dot_dimension_numbers<[1], [0], [0], [1], [0, 0, 1, 1], [], []>} : vector<8x32xbf16>, vector<32x128xbf16>, vector<8x128xf32> -> vector<8x128xf32>
    %136 = vector.extract_strided_slice %135 {offsets = [0, 0], sizes = [8, 64], strides = [1, 1]} : vector<8x128xf32> to vector<8x64xf32>
    %137 = vector.extract_strided_slice %135 {offsets = [0, 64], sizes = [8, 64], strides = [1, 1]} : vector<8x128xf32> to vector<8x64xf32>
    %cst_36 = arith.constant 0.000000e+00 : f32
    %138 = vector.broadcast %cst_36 : f32 to vector<8x64xf32>
    %139 = arith.subf %138, %136 : vector<8x64xf32>
    %140 = math.exp %139 : vector<8x64xf32>
    %cst_37 = arith.constant 1.000000e+00 : f32
    %141 = vector.broadcast %cst_37 : f32 to vector<8x64xf32>
    %142 = arith.addf %141, %140 : vector<8x64xf32>
    %143 = tpu.reciprocal %142 {approx = true} : vector<8x64xf32> -> vector<8x64xf32>
    %144 = arith.mulf %136, %143 : vector<8x64xf32>
    %145 = arith.mulf %144, %137 : vector<8x64xf32>
    %146 = arith.truncf %145 : vector<8x64xf32> to vector<8x64xbf16>
    %c0_38 = arith.constant 0 : index
    %c0_39 = arith.constant 0 : index
    %c0_40 = arith.constant 0 : index
    %147 = vector.load %arg7[%c0_38, %c0_39, %c0_40] : memref<2x64x32xbf16, #tpu.memory_space<vmem>>, vector<1x64x32xbf16>
    %148 = vector.shape_cast %147 : vector<1x64x32xbf16> to vector<64x32xbf16>
    %cst_41 = arith.constant dense<0.000000e+00> : vector<8x32xf32>
    %149 = tpu.matmul %146, %148, %cst_41 {dimension_numbers = #tpu.dot_dimension_numbers<[1], [0], [0], [1], [0, 0, 1, 1], [], []>} : vector<8x64xbf16>, vector<64x32xbf16>, vector<8x32xf32> -> vector<8x32xf32>
    %150 = arith.extf %116 : vector<8x32xbf16> to vector<8x32xf32>
    %151 = arith.addf %150, %149 : vector<8x32xf32>
    %152 = arith.truncf %151 : vector<8x32xf32> to vector<8x32xbf16>
    %153 = vector.extract_strided_slice %15 {offsets = [1, 0], sizes = [1, 32], strides = [1, 1]} : vector<5x32xbf16> to vector<1x32xbf16>
    %154 = arith.extf %152 : vector<8x32xbf16> to vector<8x32xf32>
    %155 = arith.mulf %154, %154 : vector<8x32xf32>
    %cst_42 = arith.constant dense<0.000000e+00> : vector<8xf32>
    %156 = vector.multi_reduction <add>, %155, %cst_42 [1] : vector<8x32xf32> to vector<8xf32>
    %157 = vector.shape_cast %156 : vector<8xf32> to vector<8x1xf32>
    %cst_43 = arith.constant 3.200000e+01 : f32
    %158 = vector.broadcast %cst_43 : f32 to vector<8x1xf32>
    %159 = arith.divf %157, %158 : vector<8x1xf32>
    %cst_44 = arith.constant 9.99999974E-6 : f32
    %160 = vector.broadcast %cst_44 : f32 to vector<8x1xf32>
    %161 = arith.addf %159, %160 : vector<8x1xf32>
    %162 = math.rsqrt %161 : vector<8x1xf32>
    %163 = vector.broadcast %162 : vector<8x1xf32> to vector<8x32xf32>
    %164 = arith.mulf %154, %163 : vector<8x32xf32>
    %165 = arith.extf %153 : vector<1x32xbf16> to vector<1x32xf32>
    %166 = vector.broadcast %165 : vector<1x32xf32> to vector<8x32xf32>
    %167 = arith.mulf %164, %166 : vector<8x32xf32>
    %168 = arith.truncf %167 : vector<8x32xf32> to vector<8x32xbf16>
    %c1_45 = arith.constant 1 : index
    %c0_46 = arith.constant 0 : index
    %c0_47 = arith.constant 0 : index
    %169 = vector.load %arg4[%c1_45, %c0_46, %c0_47] : memref<2x32x112xbf16, #tpu.memory_space<vmem>>, vector<1x32x112xbf16>
    %170 = vector.shape_cast %169 : vector<1x32x112xbf16> to vector<32x112xbf16>
    %cst_48 = arith.constant dense<0.000000e+00> : vector<8x112xf32>
    %171 = tpu.matmul %168, %170, %cst_48 {dimension_numbers = #tpu.dot_dimension_numbers<[1], [0], [0], [1], [0, 0, 1, 1], [], []>} : vector<8x32xbf16>, vector<32x112xbf16>, vector<8x112xf32> -> vector<8x112xf32>
    %172 = vector.extract_strided_slice %171 {offsets = [0, 0], sizes = [8, 32], strides = [1, 1]} : vector<8x112xf32> to vector<8x32xf32>
    %173 = vector.extract_strided_slice %171 {offsets = [0, 32], sizes = [8, 16], strides = [1, 1]} : vector<8x112xf32> to vector<8x16xf32>
    %174 = vector.extract_strided_slice %171 {offsets = [0, 48], sizes = [8, 16], strides = [1, 1]} : vector<8x112xf32> to vector<8x16xf32>
    %175 = vector.extract_strided_slice %171 {offsets = [0, 64], sizes = [8, 32], strides = [1, 1]} : vector<8x112xf32> to vector<8x32xf32>
    %176 = vector.extract_strided_slice %171 {offsets = [0, 96], sizes = [8, 16], strides = [1, 1]} : vector<8x112xf32> to vector<8x16xf32>
    %177 = arith.mulf %172, %17 : vector<8x32xf32>
    %178 = arith.mulf %175, %19 : vector<8x32xf32>
    %179 = arith.addf %177, %178 : vector<8x32xf32>
    %180 = arith.truncf %179 : vector<8x32xf32> to vector<8x32xbf16>
    %181 = arith.mulf %173, %20 : vector<8x16xf32>
    %182 = arith.mulf %176, %21 : vector<8x16xf32>
    %183 = arith.addf %181, %182 : vector<8x16xf32>
    %184 = arith.truncf %183 : vector<8x16xf32> to vector<8x16xbf16>
    %185 = arith.truncf %174 : vector<8x16xf32> to vector<8x16xbf16>
    %186 = vector.extract_strided_slice %180 {offsets = [0, 0], sizes = [8, 8], strides = [1, 1]} : vector<8x32xbf16> to vector<8x8xbf16>
    %187 = vector.extract_strided_slice %180 {offsets = [0, 8], sizes = [8, 8], strides = [1, 1]} : vector<8x32xbf16> to vector<8x8xbf16>
    %188 = vector.extract_strided_slice %180 {offsets = [0, 16], sizes = [8, 8], strides = [1, 1]} : vector<8x32xbf16> to vector<8x8xbf16>
    %189 = vector.extract_strided_slice %180 {offsets = [0, 24], sizes = [8, 8], strides = [1, 1]} : vector<8x32xbf16> to vector<8x8xbf16>
    %190 = vector.shape_cast %186 : vector<8x8xbf16> to vector<1x8x8xbf16>
    %191 = vector.shape_cast %187 : vector<8x8xbf16> to vector<1x8x8xbf16>
    %192 = vector.shape_cast %188 : vector<8x8xbf16> to vector<1x8x8xbf16>
    %193 = vector.shape_cast %189 : vector<8x8xbf16> to vector<1x8x8xbf16>
    %194 = tpu.concatenate %190, %191, %192, %193 in 0 : vector<1x8x8xbf16>, vector<1x8x8xbf16>, vector<1x8x8xbf16>, vector<1x8x8xbf16> -> vector<4x8x8xbf16>
    %195 = vector.extract_strided_slice %184 {offsets = [0, 0], sizes = [8, 8], strides = [1, 1]} : vector<8x16xbf16> to vector<8x8xbf16>
    %196 = vector.extract_strided_slice %184 {offsets = [0, 0], sizes = [8, 8], strides = [1, 1]} : vector<8x16xbf16> to vector<8x8xbf16>
    %197 = vector.extract_strided_slice %184 {offsets = [0, 8], sizes = [8, 8], strides = [1, 1]} : vector<8x16xbf16> to vector<8x8xbf16>
    %198 = vector.extract_strided_slice %184 {offsets = [0, 8], sizes = [8, 8], strides = [1, 1]} : vector<8x16xbf16> to vector<8x8xbf16>
    %199 = vector.shape_cast %195 : vector<8x8xbf16> to vector<1x8x8xbf16>
    %200 = vector.shape_cast %196 : vector<8x8xbf16> to vector<1x8x8xbf16>
    %201 = vector.shape_cast %197 : vector<8x8xbf16> to vector<1x8x8xbf16>
    %202 = vector.shape_cast %198 : vector<8x8xbf16> to vector<1x8x8xbf16>
    %203 = tpu.concatenate %199, %200, %201, %202 in 0 : vector<1x8x8xbf16>, vector<1x8x8xbf16>, vector<1x8x8xbf16>, vector<1x8x8xbf16> -> vector<4x8x8xbf16>
    %204 = vector.extract_strided_slice %185 {offsets = [0, 0], sizes = [8, 8], strides = [1, 1]} : vector<8x16xbf16> to vector<8x8xbf16>
    %205 = vector.extract_strided_slice %185 {offsets = [0, 0], sizes = [8, 8], strides = [1, 1]} : vector<8x16xbf16> to vector<8x8xbf16>
    %206 = vector.extract_strided_slice %185 {offsets = [0, 8], sizes = [8, 8], strides = [1, 1]} : vector<8x16xbf16> to vector<8x8xbf16>
    %207 = vector.extract_strided_slice %185 {offsets = [0, 8], sizes = [8, 8], strides = [1, 1]} : vector<8x16xbf16> to vector<8x8xbf16>
    %208 = vector.shape_cast %204 : vector<8x8xbf16> to vector<1x8x8xbf16>
    %209 = vector.shape_cast %205 : vector<8x8xbf16> to vector<1x8x8xbf16>
    %210 = vector.shape_cast %206 : vector<8x8xbf16> to vector<1x8x8xbf16>
    %211 = vector.shape_cast %207 : vector<8x8xbf16> to vector<1x8x8xbf16>
    %212 = tpu.concatenate %208, %209, %210, %211 in 0 : vector<1x8x8xbf16>, vector<1x8x8xbf16>, vector<1x8x8xbf16>, vector<1x8x8xbf16> -> vector<4x8x8xbf16>
    "tpu.trace_start"() <{level = 10 : i32, message = "hqd,hkd->hqk"}> : () -> ()
    %cst_49 = arith.constant dense<0.000000e+00> : vector<4x8x8xf32>
    %213 = tpu.matmul %194, %203, %cst_49 {dimension_numbers = #tpu.dot_dimension_numbers<[2], [2], [1], [1], [0, 0, 0, 1, 1, 1], [0], [0]>} : vector<4x8x8xbf16>, vector<4x8x8xbf16>, vector<4x8x8xf32> -> vector<4x8x8xf32>
    "tpu.trace_stop"() : () -> ()
    %cst_50 = arith.constant 0.353553385 : f32
    %214 = vector.broadcast %cst_50 : f32 to vector<4x8x8xf32>
    %215 = arith.mulf %213, %214 : vector<4x8x8xf32>
    %cst_51 = arith.constant 0xFF800000 : f32
    %216 = vector.shape_cast %14 : vector<1x8x8xi1> to vector<1x8x8xi1>
    %217 = vector.broadcast %216 : vector<1x8x8xi1> to vector<4x8x8xi1>
    %218 = vector.broadcast %cst_51 : f32 to vector<4x8x8xf32>
    %219 = arith.select %217, %215, %218 : vector<4x8x8xi1>, vector<4x8x8xf32>
    %cst_52 = arith.constant dense<0xFF800000> : vector<4x8xf32>
    %220 = vector.multi_reduction <maximumf>, %219, %cst_52 [2] : vector<4x8x8xf32> to vector<4x8xf32>
    %221 = vector.shape_cast %220 : vector<4x8xf32> to vector<4x8x1xf32>
    %222 = vector.broadcast %221 : vector<4x8x1xf32> to vector<4x8x8xf32>
    %223 = arith.subf %219, %222 : vector<4x8x8xf32>
    %224 = math.exp %223 : vector<4x8x8xf32>
    %cst_53 = arith.constant dense<0.000000e+00> : vector<4x8xf32>
    %225 = vector.multi_reduction <add>, %224, %cst_53 [2] : vector<4x8x8xf32> to vector<4x8xf32>
    %226 = vector.shape_cast %225 : vector<4x8xf32> to vector<4x8x1xf32>
    %227 = tpu.reciprocal %226 {approx = true} : vector<4x8x1xf32> -> vector<4x8x1xf32>
    %228 = vector.broadcast %227 : vector<4x8x1xf32> to vector<4x8x8xf32>
    %229 = arith.mulf %224, %228 : vector<4x8x8xf32>
    %230 = arith.truncf %229 : vector<4x8x8xf32> to vector<4x8x8xbf16>
    "tpu.trace_start"() <{level = 10 : i32, message = "hqk,hkd->hqd"}> : () -> ()
    %cst_54 = arith.constant dense<0.000000e+00> : vector<4x8x8xf32>
    %231 = tpu.matmul %230, %212, %cst_54 {dimension_numbers = #tpu.dot_dimension_numbers<[2], [1], [1], [2], [0, 0, 0, 1, 1, 2], [0], [0]>} : vector<4x8x8xbf16>, vector<4x8x8xbf16>, vector<4x8x8xf32> -> vector<4x8x8xf32>
    "tpu.trace_stop"() : () -> ()
    %232 = vector.extract_strided_slice %231 {offsets = [0, 0, 0], sizes = [1, 8, 8], strides = [1, 1, 1]} : vector<4x8x8xf32> to vector<1x8x8xf32>
    %233 = vector.shape_cast %232 : vector<1x8x8xf32> to vector<8x8xf32>
    %234 = vector.extract_strided_slice %231 {offsets = [1, 0, 0], sizes = [1, 8, 8], strides = [1, 1, 1]} : vector<4x8x8xf32> to vector<1x8x8xf32>
    %235 = vector.shape_cast %234 : vector<1x8x8xf32> to vector<8x8xf32>
    %236 = vector.extract_strided_slice %231 {offsets = [2, 0, 0], sizes = [1, 8, 8], strides = [1, 1, 1]} : vector<4x8x8xf32> to vector<1x8x8xf32>
    %237 = vector.shape_cast %236 : vector<1x8x8xf32> to vector<8x8xf32>
    %238 = vector.extract_strided_slice %231 {offsets = [3, 0, 0], sizes = [1, 8, 8], strides = [1, 1, 1]} : vector<4x8x8xf32> to vector<1x8x8xf32>
    %239 = vector.shape_cast %238 : vector<1x8x8xf32> to vector<8x8xf32>
    %240 = tpu.concatenate %233, %235, %237, %239 in 1 : vector<8x8xf32>, vector<8x8xf32>, vector<8x8xf32>, vector<8x8xf32> -> vector<8x32xf32>
    %241 = arith.truncf %240 : vector<8x32xf32> to vector<8x32xbf16>
    %c1_55 = arith.constant 1 : index
    %c0_56 = arith.constant 0 : index
    %c0_57 = arith.constant 0 : index
    %242 = vector.load %arg5[%c1_55, %c0_56, %c0_57] : memref<2x32x32xbf16, #tpu.memory_space<vmem>>, vector<1x32x32xbf16>
    %243 = vector.shape_cast %242 : vector<1x32x32xbf16> to vector<32x32xbf16>
    %cst_58 = arith.constant dense<0.000000e+00> : vector<8x32xf32>
    %244 = tpu.matmul %241, %243, %cst_58 {dimension_numbers = #tpu.dot_dimension_numbers<[1], [0], [0], [1], [0, 0, 1, 1], [], []>} : vector<8x32xbf16>, vector<32x32xbf16>, vector<8x32xf32> -> vector<8x32xf32>
    %245 = arith.extf %152 : vector<8x32xbf16> to vector<8x32xf32>
    %246 = arith.addf %245, %244 : vector<8x32xf32>
    %247 = arith.truncf %246 : vector<8x32xf32> to vector<8x32xbf16>
    %248 = vector.extract_strided_slice %15 {offsets = [3, 0], sizes = [1, 32], strides = [1, 1]} : vector<5x32xbf16> to vector<1x32xbf16>
    %249 = arith.extf %247 : vector<8x32xbf16> to vector<8x32xf32>
    %250 = arith.mulf %249, %249 : vector<8x32xf32>
    %cst_59 = arith.constant dense<0.000000e+00> : vector<8xf32>
    %251 = vector.multi_reduction <add>, %250, %cst_59 [1] : vector<8x32xf32> to vector<8xf32>
    %252 = vector.shape_cast %251 : vector<8xf32> to vector<8x1xf32>
    %cst_60 = arith.constant 3.200000e+01 : f32
    %253 = vector.broadcast %cst_60 : f32 to vector<8x1xf32>
    %254 = arith.divf %252, %253 : vector<8x1xf32>
    %cst_61 = arith.constant 9.99999974E-6 : f32
    %255 = vector.broadcast %cst_61 : f32 to vector<8x1xf32>
    %256 = arith.addf %254, %255 : vector<8x1xf32>
    %257 = math.rsqrt %256 : vector<8x1xf32>
    %258 = vector.broadcast %257 : vector<8x1xf32> to vector<8x32xf32>
    %259 = arith.mulf %249, %258 : vector<8x32xf32>
    %260 = arith.extf %248 : vector<1x32xbf16> to vector<1x32xf32>
    %261 = vector.broadcast %260 : vector<1x32xf32> to vector<8x32xf32>
    %262 = arith.mulf %259, %261 : vector<8x32xf32>
    %263 = arith.truncf %262 : vector<8x32xf32> to vector<8x32xbf16>
    %c1_62 = arith.constant 1 : index
    %c0_63 = arith.constant 0 : index
    %c0_64 = arith.constant 0 : index
    %264 = vector.load %arg6[%c1_62, %c0_63, %c0_64] : memref<2x32x128xbf16, #tpu.memory_space<vmem>>, vector<1x32x128xbf16>
    %265 = vector.shape_cast %264 : vector<1x32x128xbf16> to vector<32x128xbf16>
    %cst_65 = arith.constant dense<0.000000e+00> : vector<8x128xf32>
    %266 = tpu.matmul %263, %265, %cst_65 {dimension_numbers = #tpu.dot_dimension_numbers<[1], [0], [0], [1], [0, 0, 1, 1], [], []>} : vector<8x32xbf16>, vector<32x128xbf16>, vector<8x128xf32> -> vector<8x128xf32>
    %267 = vector.extract_strided_slice %266 {offsets = [0, 0], sizes = [8, 64], strides = [1, 1]} : vector<8x128xf32> to vector<8x64xf32>
    %268 = vector.extract_strided_slice %266 {offsets = [0, 64], sizes = [8, 64], strides = [1, 1]} : vector<8x128xf32> to vector<8x64xf32>
    %cst_66 = arith.constant 0.000000e+00 : f32
    %269 = vector.broadcast %cst_66 : f32 to vector<8x64xf32>
    %270 = arith.subf %269, %267 : vector<8x64xf32>
    %271 = math.exp %270 : vector<8x64xf32>
    %cst_67 = arith.constant 1.000000e+00 : f32
    %272 = vector.broadcast %cst_67 : f32 to vector<8x64xf32>
    %273 = arith.addf %272, %271 : vector<8x64xf32>
    %274 = tpu.reciprocal %273 {approx = true} : vector<8x64xf32> -> vector<8x64xf32>
    %275 = arith.mulf %267, %274 : vector<8x64xf32>
    %276 = arith.mulf %275, %268 : vector<8x64xf32>
    %277 = arith.truncf %276 : vector<8x64xf32> to vector<8x64xbf16>
    %c1_68 = arith.constant 1 : index
    %c0_69 = arith.constant 0 : index
    %c0_70 = arith.constant 0 : index
    %278 = vector.load %arg7[%c1_68, %c0_69, %c0_70] : memref<2x64x32xbf16, #tpu.memory_space<vmem>>, vector<1x64x32xbf16>
    %279 = vector.shape_cast %278 : vector<1x64x32xbf16> to vector<64x32xbf16>
    %cst_71 = arith.constant dense<0.000000e+00> : vector<8x32xf32>
    %280 = tpu.matmul %277, %279, %cst_71 {dimension_numbers = #tpu.dot_dimension_numbers<[1], [0], [0], [1], [0, 0, 1, 1], [], []>} : vector<8x64xbf16>, vector<64x32xbf16>, vector<8x32xf32> -> vector<8x32xf32>
    %281 = arith.extf %247 : vector<8x32xbf16> to vector<8x32xf32>
    %282 = arith.addf %281, %280 : vector<8x32xf32>
    %283 = arith.truncf %282 : vector<8x32xf32> to vector<8x32xbf16>
    %284 = vector.extract_strided_slice %15 {offsets = [4, 0], sizes = [1, 32], strides = [1, 1]} : vector<5x32xbf16> to vector<1x32xbf16>
    %285 = arith.extf %283 : vector<8x32xbf16> to vector<8x32xf32>
    %286 = arith.mulf %285, %285 : vector<8x32xf32>
    %cst_72 = arith.constant dense<0.000000e+00> : vector<8xf32>
    %287 = vector.multi_reduction <add>, %286, %cst_72 [1] : vector<8x32xf32> to vector<8xf32>
    %288 = vector.shape_cast %287 : vector<8xf32> to vector<8x1xf32>
    %cst_73 = arith.constant 3.200000e+01 : f32
    %289 = vector.broadcast %cst_73 : f32 to vector<8x1xf32>
    %290 = arith.divf %288, %289 : vector<8x1xf32>
    %cst_74 = arith.constant 9.99999974E-6 : f32
    %291 = vector.broadcast %cst_74 : f32 to vector<8x1xf32>
    %292 = arith.addf %290, %291 : vector<8x1xf32>
    %293 = math.rsqrt %292 : vector<8x1xf32>
    %294 = vector.broadcast %293 : vector<8x1xf32> to vector<8x32xf32>
    %295 = arith.mulf %285, %294 : vector<8x32xf32>
    %296 = arith.extf %284 : vector<1x32xbf16> to vector<1x32xf32>
    %297 = vector.broadcast %296 : vector<1x32xf32> to vector<8x32xf32>
    %298 = arith.mulf %295, %297 : vector<8x32xf32>
    %299 = arith.truncf %298 : vector<8x32xf32> to vector<8x32xbf16>
    %300 = vector.extract_strided_slice %299 {offsets = [7, 0], sizes = [1, 32], strides = [1, 1]} : vector<8x32xbf16> to vector<1x32xbf16>
    %c0_75 = arith.constant 0 : index
    %c0_76 = arith.constant 0 : index
    %301 = vector.load %arg8[%c0_75, %c0_76] : memref<32x64xbf16, #tpu.memory_space<vmem>>, vector<32x64xbf16>
    %cst_77 = arith.constant dense<0.000000e+00> : vector<1x64xf32>
    %302 = tpu.matmul %300, %301, %cst_77 {dimension_numbers = #tpu.dot_dimension_numbers<[1], [0], [0], [1], [0, 0, 1, 1], [], []>} : vector<1x32xbf16>, vector<32x64xbf16>, vector<1x64xf32> -> vector<1x64xf32>
    %cst_78 = arith.constant dense<0xFF800000> : vector<1xf32>
    %303 = vector.multi_reduction <maximumf>, %302, %cst_78 [1] : vector<1x64xf32> to vector<1xf32>
    %304 = vector.shape_cast %303 : vector<1xf32> to vector<1x1xf32>
    %305 = tpu.iota {dimensions = array<i32: 1>} : vector<1x64xi32>
    %306 = arith.sitofp %305 : vector<1x64xi32> to vector<1x64xf32>
    %307 = vector.broadcast %304 : vector<1x1xf32> to vector<1x64xf32>
    %308 = arith.cmpf oeq, %302, %307 : vector<1x64xf32>
    %cst_79 = arith.constant 6.400000e+01 : f32
    %309 = vector.broadcast %cst_79 : f32 to vector<1x64xf32>
    %310 = arith.select %308, %306, %309 : vector<1x64xi1>, vector<1x64xf32>
    %cst_80 = arith.constant dense<0x7F800000> : vector<1xf32>
    %311 = vector.multi_reduction <minimumf>, %310, %cst_80 [1] : vector<1x64xf32> to vector<1xf32>
    %312 = vector.shape_cast %311 : vector<1xf32> to vector<1x1xf32>
    %313 = arith.fptosi %312 : vector<1x1xf32> to vector<1x1xi32>
    %c0_81 = arith.constant 0 : index
    %c0_82 = arith.constant 0 : index
    %314 = vector.load %arg9[%c0_81, %c0_82] : memref<1x1xi32, #tpu.memory_space<vmem>>, vector<1x1xi32>
    tpu.vector_store %arg9[%c0_81, %c0_82], %313 {strides = array<i32>} : memref<1x1xi32, #tpu.memory_space<vmem>>, vector<1x1xi32>,
    return
  }
}

</mosaic_0001>

<bundles_post_ra>
// kernel: transformer_forward.1
= control target key start
LH: loop header
LB: loop body
LE: loop exit
PB: predicated region body
PF: predicated region fallthrough
CT: control target
= control target key end

     0   :  { %14 = vsyncpa [#allocation3], 0  ;;  %s2695_s0 = inlined_call_operand.vmem [shape: s32[8,1], index: 0, kind: input, shape index: {}]   ;;  %s2696_s1 = inlined_call_operand.vmem [shape: bf16[64,32], index: 1, kind: input, shape index: {}]   ;;  %s2697_s2 = inlined_call_operand.hbm [shape: bf16[5,32], index: 2, kind: input, shape index: {}]   ;;  %s2698_s3 = inlined_call_operand.vmem [shape: f32[2,8,32], index: 3, kind: input, shape index: {}]   ;;  %s2699_s4 = inlined_call_operand.vmem [shape: bf16[2,32,112], index: 4, kind: input, shape index: {}]   ;;  %s2700_s5 = inlined_call_operand.vmem [shape: bf16[2,32,32], index: 5, kind: input, shape index: {}]   ;;  %s2701_s6 = inlined_call_operand.vmem [shape: bf16[2,32,128], index: 6, kind: input, shape index: {}]   ;;  %s2702_s7 = inlined_call_operand.vmem [shape: bf16[2,64,32], index: 7, kind: input, shape index: {}]   ;;  %s2703_s8 = inlined_call_operand.vmem [shape: bf16[32,64], index: 8, kind: input, shape index: {}]   ;;  %s2704_s9 = inlined_call_operand.hbm [shape: s32[1,1], index: 9, kind: output, shape index: {}]  }
   0x1   :  { %15 = vsyncpa [#allocation4], 0  ;;  %s2264_s30 = smov [#allocation2]  }
   0x2   :  { %s26_s10 = sshll.u32 %s2264_s30, 4  ;;  %s27_s10 = int_to_ptr.vmem [resolvable:$true] %s26_s10 }
   0x3   :  { %s2228_s11 = scalar_lea.vmem %s27_s10, 64  ;;  %p2233_p1 = scmp.lt.s32.totalorder %s27_s10, %s27_s10 }
   0x4   :  { %p2229_p0 = scmp.ne.s32.totalorder %s27_s10, %s2228_s11  ;;  %p2234_p2 = scmp.lt.s32.totalorder %s2228_s11, %s2228_s11 }
   0x6   :  { %p2235_p3 = por %p2234_p2, %p2233_p1 }
   0x8   :  { %p2236_p4 = pnand %p2235_p3, %p2229_p0 }
   0xa   :  { %2239 = shalt.err (!%p2236_p4)
}
   0xb   :  { %29 = dma.hbm_to_vmem [thread:$0]  %s2697_s2, 64, %s27_s10, [#allocation3]  }
   0xc   :  { %2260 = dma.done.wait [#allocation3], 64  }
   0xd   :  { %2261 = vsyncadd [#allocation3], 4294967232  ;;  %v2265_v0 = vmov 0   ;;  %v2266_v1 = vmov 0.0   ;;  %v46_v2 = vld [vmem:[%s2695_s0] sm:$0xff]  ;;  %vm2267_vm0 = vmmov 0   ;;  %v47_v7 = vlaneseq }
   0xe   :  { %2143 = vset.pattern.permute.xlu0 %v2265_v0  ;;  %1938 = vmatprep.subr.bf16.mxu0 %v2266_v1  ;;  %v2144_v3 = vld [vmem:[%s2696_s1 + $0x18] sm:$0xff]   ;;  %v2145_v4 = vld [vmem:[%s2696_s1 + $0x10] sm:$0xff]   ;;  %v2146_v5 = vld [vmem:[%s2696_s1 + $0x8] sm:$0xff]   ;;  %vm87_vm2 = vcmask 523264   ;;  %vm141_vm3 = vcmask 261120   ;;  %s2268_s27 = smov 96  }
   0xf   :  { %1950 = vmatprep.subr.bf16.mxu1 %v2266_v1  ;;  %1946 = vmatprep.mubr.msk.bf16.mxu0 %vm2267_vm0, %v2266_v1  ;;  %v2147_v6 = vld [vmem:[%s2696_s1] sm:$0xff]   ;;  %v2357_v8 = vand.u32 127, %v47_v7  ;;  %v2148_v20 = vld [vmem:[%s2699_s4 + $0x8] sm:$0xff]   ;;  %s2269_s30 = smov 32   ;;  %s2270_s10 = smov 64   ;;  %v2388_v27 = vshrl.u32 %v47_v7, 7 }
  0x10   :  { %1954 = vmatprep.mubr.msk.bf16.mxu1 %vm2267_vm0, %v2266_v1  ;;  %50 = vperm.xlu0 %2143, %v46_v2   ;;  %v2149_v21 = vld [vmem:[%s2699_s4] sm:$0xff]   ;;  %v1802_v22 = vld [vmem:[%s2698_s3 + $0x8] sm:$0xff]  ;;  %s2272_s11 = smov 112   ;;  %vm259_vm4 = vcmask 64512   ;;  %s2273_s12 = smov 104   ;;  %vm503_vm6 = vcmask 1043456  }
  0x11   :  { %1939 = vmatpush3.bf16.msra.mxu0 %v2144_v3  ;;  %1951 = vmatpush3.bf16.msra.mxu1 %v2148_v20  ;;  %v2384_v23 = vld [vmem:[%s2698_s3] sm:$0xff]  ;;  %v153_v30 = vsub.s32 0, %v2388_v27  ;;  %s2271_s3 = smov 120   ;;  %vm2442_vm5 = vcmp.le.s32.totalorder %v2357_v8, %v2388_v27  ;;  %s2274_s13 = smov 80   ;;  %vm694_vm7 = vcmask 130048   ;;  %vm696_vm8 = vcmask 195584  }
  0x12   :  { %1940 = vmatprep.subr.bf16.mxu0 %v2266_v1  ;;  %1952 = vmatprep.subr.bf16.mxu1 %v2266_v1  ;;  %v135_v28 = vld [vmem:[#allocation2] sm:$0x7]  ;;  %s2275_s17 = smov 8   ;;  %s2276_s18 = smov 16   ;;  %vm1769_vm9 = vcmask 516096   ;;  %vm1780_vm11 = vcmask 0  }
  0x13   :  { %233 = vrot.lane.b32.xlu1 %v1802_v22, %s2268_s27  ;;  %v2390_v29 = vunpack.c.l.bf16 %v135_v28  ;;  %s2277_s0 = smov 24  }
  0x15   :  { %1941 = vmatpush3.bf16.msra.mxu0 %v2145_v4  ;;  %1953 = vmatpush3.bf16.msra.mxu1 %v2149_v21  ;;  %v154_v31 = vrot.slane %v2390_v29, %v153_v30 }
  0x16   :  { %1942 = vmatprep.subr.bf16.mxu0 %v2266_v1  ;;  %1958 = vmatprep.subr.bf16.mxu1 %v2266_v1 }
  0x17   :  { %229 = vrot.lane.b32.xlu1 %v2384_v23, %s2269_s30 }
  0x19   :  { %1943 = vmatpush3.bf16.msra.mxu0 %v2146_v5 }
  0x1a   :  { %1944 = vmatprep.subr.bf16.mxu0 %v2266_v1 }
  0x1b   :  { %218 = vrot.lane.b32.xlu1 %v1802_v22, %s2270_s10 }
  0x1d   :  { %1945 = vmatpush3.bf16.msra.mxu0 %v2147_v6 }
  0x1e   :  { %1964 = vmatprep.subr.bf16.mxu0 %v2266_v1 }
  0x85   :  { %v2398_v36 = vpop.permute.xlu1 %233 }
  0x89   :  { %v2400_v37 = vpop.permute.xlu1 %229 }
  0x8b   :  { %v51_v9 = vpop.permute.xlu0 %50 }
  0x8c   :  { %vm52_vm1 = vcmp.eq.s32.totalorder %v2357_v8, %v51_v9 }
  0x8d   :  { %v53_v10 = vsel %vm52_vm1, 1.0, %v2266_v1  ;;  %v2406_v40 = vpop.permute.xlu1 %218 }
  0x8e   :  { %v54_v11 = vpack.c.bf16 %v53_v10, %v53_v10 }
  0x90   :  { %1947 = vmatmul.mubr.msk.bf16.vlgmr.msra.gmra.mxu0 %vm87_vm2, %v54_v11 }
  0x91   :  { %1966 = vmatprep.mubr.msk.bf16.mxu0 %vm2267_vm0, %v2266_v1 }
 0x150   :  { %v125_v12 = vpop.f32.mrf.mxu0 }
 0x151   :  { %v131_v13 = vpack.c.bf16 %v125_v12, %v125_v12 }
 0x152   :  { %v1948_v14 = vpop.f32.mrf.mxu0 }
 0x153   :  { %v2364_v15 = vunpack.c.l.bf16 %v131_v13 }
 0x154   :  { %v128_v16 = vpop.f32.mrf.mxu0 }
 0x155   :  { %v140_v17 = vmul.f32 %v2364_v15, %v2364_v15 }
 0x156   :  { %v1949_v18 = vpop.f32.mrf.mxu0 }
 0x157   :  { %v142_v19 = vsel %vm141_vm3, %v140_v17, 0.0 }
 0x158   :  { %143 = vadd.xlane.f32.xlu0 %v142_v19 }
 0x1e1   :  { %v144_v24 = vpop.xlane.xlu0 %143 }
 0x1e2   :  { %v146_v25 = vmul.f32 0.03125, %v144_v24 }
 0x1e4   :  { %v147_v26 = vadd.f32 1e-05, %v146_v25 }
 0x1e6   :  { %2170 = vrsqrt.f32 %v147_v26 }
 0x1f3   :  { %v2171_v32 = vpop.eup %2170 }
 0x1f4   :  { %v149_v33 = vmul.f32 %v2171_v32, %v2364_v15 }
 0x1f6   :  { %v155_v34 = vmul.f32 %v154_v31, %v149_v33 }
 0x1f8   :  { %v156_v35 = vpack.c.bf16 %v155_v34, %v155_v34 }
 0x1fa   :  { %1955 = vmatmul.mubr.msk.bf16.vlgmr.msra.gmra.mxu1 %vm141_vm3, %v156_v35 }
 0x1fb   :  { %1960 = vmatprep.mubr.msk.bf16.mxu1 %vm2267_vm0, %v2266_v1 }
 0x2ba   :  { %v2402_v38 = vpop.f32.mrf.mxu1 }
 0x2bb   :  { %v236_v39 = vmul.f32 %v2398_v36, %v2402_v38  ;;  %v221_v43 = vmul.f32 %v2406_v40, %v2402_v38  ;;  %v232_v45 = vmul.f32 %v2400_v37, %v2402_v38  ;;  %v216_v49 = vmul.f32 %v2402_v38, %v2384_v23 }
 0x2bc   :  { %v1956_v41 = vpop.f32.mrf.mxu1  ;;  %v243_v32 = vpack.c.bf16 %v2402_v38, %v2402_v38 }
 0x2bd   :  { %238 = vrot.lane.b32.xlu1 %v236_v39, %s2270_s10 }
 0x2be   :  { %v213_v42 = vpop.f32.mrf.mxu1 }
 0x2c0   :  { %v1957_v44 = vpop.f32.mrf.mxu1 }
 0x2c1   :  { %223 = vrot.lane.b32.xlu1 %v221_v43, %s2270_s10 }
 0x32f   :  { %v239_v46 = vpop.permute.xlu1 %238 }
 0x330   :  { %v241_v47 = vadd.f32 %v239_v46, %v232_v45 }
 0x332   :  { %v242_v48 = vpack.c.bf16 %v241_v47, %v241_v47 }
 0x333   :  { %v224_v50 = vpop.permute.xlu1 %223 }
 0x334   :  { %v226_v51 = vadd.f32 %v224_v50, %v216_v49  ;;  %252 = vrot.lane.b32.xlu1 %v242_v48, %s2271_s3 }
 0x336   :  { %v227_v52 = vpack.c.bf16 %v226_v51, %v226_v51 }
 0x338   :  { %257 = vrot.lane.b32.xlu1 %v242_v48, %s2268_s27  ;;  %247 = vrot.lane.b32.xlu0 %v227_v52, %s2272_s11 }
 0x3a6   :  { %v253_v53 = vpop.permute.xlu1 %252 }
 0x3a7   :  { %349 = vrot.lane.b32.xlu1 %v253_v53, %s2268_s27 }
 0x3aa   :  { %v258_v54 = vpop.permute.xlu1 %257  ;;  %v248_v59 = vpop.permute.xlu0 %247 }
 0x3ab   :  { %v264_v55 = vsel %vm259_vm4, %v258_v54, 0  ;;  %245 = vrot.lane.b32.xlu1 %v227_v52, %s2271_s3 }
 0x3ac   :  { %1959 = vmatpush3.bf16.xpose.msra.mxu1 %v264_v55  ;;  %1965 = vmatpush3.bf16.xpose.msra.mxu0 %v264_v55 }
 0x3ad   :  { %1970 = vmatprep.subr.bf16.mxu1 %v2266_v1  ;;  %1976 = vmatprep.subr.bf16.mxu0 %v2266_v1 }
 0x3af   :  { %249 = vrot.lane.b32.xlu1 %v227_v52, %s2273_s12 }
 0x3b3   :  { %1961 = vmatmul.mubr.msk.bf16.vlgmr.msra.gmra.mxu1 %vm259_vm4, %v227_v52 }
 0x3b4   :  { %1972 = vmatprep.mubr.msk.bf16.mxu1 %vm2267_vm0, %v2266_v1 }
 0x419   :  { %v350_v56 = vpop.permute.xlu1 %349 }
 0x41a   :  { %v355_v57 = vsel %vm259_vm4, %v350_v56, 0 }
 0x41b   :  { %1971 = vmatpush3.bf16.xpose.msra.mxu1 %v355_v57 }
 0x41c   :  { %1982 = vmatprep.subr.bf16.mxu1 %v2266_v1 }
 0x41d   :  { %v246_v58 = vpop.permute.xlu1 %245 }
 0x41e   :  { %1967 = vmatmul.mubr.msk.bf16.vlgmr.msra.gmra.mxu0 %vm259_vm4, %v246_v58 }
 0x41f   :  { %1977 = vmatpush3.bf16.xpose.msra.mxu0 %v355_v57  ;;  %1978 = vmatprep.mubr.msk.bf16.mxu0 %vm2267_vm0, %v2266_v1 }
 0x420   :  { %1988 = vmatprep.subr.bf16.mxu0 %v2266_v1 }
 0x421   :  { %v250_v60 = vpop.permute.xlu1 %249 }
 0x422   :  { %1973 = vmatmul.mubr.msk.bf16.vlgmr.msra.gmra.mxu1 %vm259_vm4, %v248_v59 }
 0x423   :  { %1984 = vmatprep.mubr.msk.bf16.mxu1 %vm2267_vm0, %v2266_v1 }
 0x426   :  { %1979 = vmatmul.mubr.msk.bf16.vlgmr.msra.gmra.mxu0 %vm259_vm4, %v250_v60 }
 0x427   :  { %1990 = vmatprep.mubr.msk.bf16.mxu0 %vm2267_vm0, %v2266_v1 }
 0x473   :  { %v300_v62 = vpop.f32.mrf.mxu1 }
 0x474   :  { %v440_v63 = vmul.f32 0.35355338, %v300_v62 }
 0x475   :  { %v1962_v0 = vpop.f32.mrf.mxu1 }
 0x476   :  { %v446_v2 = vsel %vm2442_vm5, %v440_v63, -inf }
 0x477   :  { %v303_v3 = vpop.f32.mrf.mxu1  ;;  %v450_v4 = vsel %vm259_vm4, %v446_v2, -inf }
 0x478   :  { %451 = vmax.xlane.f32.xlu1 %v450_v4 }
 0x479   :  { %v1963_v5 = vpop.f32.mrf.mxu1 }
 0x4de   :  { %v343_v6 = vpop.f32.mrf.mxu0 }
 0x4df   :  { %v441_v7 = vmul.f32 0.35355338, %v343_v6 }
 0x4e0   :  { %v1968_v9 = vpop.f32.mrf.mxu0 }
 0x4e1   :  { %v447_v10 = vsel %vm2442_vm5, %v441_v7, -inf }
 0x4e2   :  { %v346_v11 = vpop.f32.mrf.mxu0  ;;  %v391_v12 = vpop.f32.mrf.mxu1  ;;  %v453_v13 = vsel %vm259_vm4, %v447_v10, -inf }
 0x4e3   :  { %v442_v14 = vmul.f32 0.35355338, %v391_v12  ;;  %454 = vmax.xlane.f32.xlu0 %v453_v13 }
 0x4e4   :  { %v1969_v16 = vpop.f32.mrf.mxu0  ;;  %v1974_v17 = vpop.f32.mrf.mxu1 }
 0x4e5   :  { %v448_v18 = vsel %vm2442_vm5, %v442_v14, -inf }
 0x4e6   :  { %v394_v19 = vpop.f32.mrf.mxu1  ;;  %v434_v20 = vpop.f32.mrf.mxu0  ;;  %v456_v21 = vsel %vm259_vm4, %v448_v18, -inf }
 0x4e7   :  { %v443_v22 = vmul.f32 0.35355338, %v434_v20  ;;  %457 = vmax.xlane.f32.xlu1 %v456_v21  ;;  %v2150_v21 = vld [vmem:[%s2700_s5 + $0x8] sm:$0xff]  }
 0x4e8   :  { %v1975_v24 = vpop.f32.mrf.mxu1  ;;  %v1980_v25 = vpop.f32.mrf.mxu0 }
 0x4e9   :  { %v449_v26 = vsel %vm2442_vm5, %v443_v22, -inf  ;;  %v2151_v22 = vld [vmem:[%s2700_s5] sm:$0xff]  }
 0x4ea   :  { %v437_v28 = vpop.f32.mrf.mxu0  ;;  %v459_v30 = vsel %vm259_vm4, %v449_v26, -inf }
 0x4eb   :  { %460 = vmax.xlane.f32.xlu1 %v459_v30 }
 0x4ec   :  { %v1981_v31 = vpop.f32.mrf.mxu0 }
 0x4fc   :  { %255 = vrot.lane.b32.xlu1 %v243_v32, %s2271_s3 }
 0x500   :  { %498 = vrot.lane.b32.xlu1 %v243_v32, %s2274_s13 }
 0x501   :  { %v452_v33 = vpop.xlane.xlu1 %451 }
 0x502   :  { %v462_v34 = vsub.f32 %v446_v2, %v452_v33 }
 0x504   :  { %v466_v35 = vmul.f32 1.442695, %v462_v34 }
 0x506   :  { %2172 = vpow2.f32 %v466_v35 }
 0x513   :  { %v2173_v39 = vpop.eup %2172 }
 0x514   :  { %v474_v41 = vsel %vm259_vm4, %v2173_v39, 0.0 }
 0x515   :  { %475 = vadd.xlane.f32.xlu0 %v474_v41 }
 0x56c   :  { %v455_v42 = vpop.xlane.xlu0 %454 }
 0x56d   :  { %v463_v43 = vsub.f32 %v447_v10, %v455_v42 }
 0x56f   :  { %v468_v44 = vmul.f32 1.442695, %v463_v43 }
 0x570   :  { %v458_v45 = vpop.xlane.xlu1 %457 }
 0x571   :  { %2174 = vpow2.f32 %v468_v44  ;;  %v464_v46 = vsub.f32 %v448_v18, %v458_v45 }
 0x573   :  { %v470_v38 = vmul.f32 1.442695, %v464_v46 }
 0x574   :  { %v461_v47 = vpop.xlane.xlu1 %460 }
 0x575   :  { %2176 = vpow2.f32 %v470_v38  ;;  %v465_v48 = vsub.f32 %v449_v26, %v461_v47 }
 0x577   :  { %v472_v49 = vmul.f32 1.442695, %v465_v48 }
 0x578   :  { %v256_v50 = vpop.permute.xlu1 %255 }
 0x579   :  { %2178 = vpow2.f32 %v472_v49 }
 0x57c   :  { %v499_v51 = vpop.permute.xlu1 %498 }
 0x57d   :  { %v505_v52 = vsel %vm503_vm6, %v499_v51, 0 }
 0x57e   :  { %v2175_v53 = vpop.eup %2174  ;;  %1983 = vmatpush3.bf16.msra.mxu1 %v505_v52  ;;  %1989 = vmatpush3.bf16.msra.mxu0 %v505_v52 }
 0x57f   :  { %v477_v54 = vsel %vm259_vm4, %v2175_v53, 0.0  ;;  %1994 = vmatprep.subr.bf16.mxu1 %v2266_v1  ;;  %2000 = vmatprep.subr.bf16.mxu0 %v2266_v1 }
 0x580   :  { %478 = vadd.xlane.f32.xlu0 %v477_v54 }
 0x582   :  { %v2177_v55 = vpop.eup %2176 }
 0x583   :  { %v480_v56 = vsel %vm259_vm4, %v2177_v55, 0.0 }
 0x584   :  { %481 = vadd.xlane.f32.xlu0 %v480_v56 }
 0x586   :  { %v2179_v57 = vpop.eup %2178 }
 0x587   :  { %v483_v58 = vsel %vm259_vm4, %v2179_v57, 0.0 }
 0x588   :  { %484 = vadd.xlane.f32.xlu0 %v483_v58  ;;  %v2153_v58 = vld [vmem:[%s2701_s6] sm:$0xff]  }
 0x59e   :  { %v476_v59 = vpop.xlane.xlu0 %475  ;;  %590 = vrot.lane.b32.xlu0 %v256_v50, %s2274_s13 }
 0x59f   :  { %2180 = vrcp.f32 %v476_v59 }
 0x5ac   :  { %v2181_v60 = vpop.eup %2180 }
 0x5ad   :  { %v490_v62 = vmul.f32 %v2181_v60, %v2173_v39 }
 0x5af   :  { %v494_v63 = vpack.c.bf16 %v490_v62, %v490_v62  ;;  %v771_v62 = vsub.s32 2, %v2388_v27 }
 0x5b1   :  { %1985 = vmatmul.mubr.msk.bf16.vlgmr.msra.gmra.mxu1 %vm259_vm4, %v494_v63  ;;  %v772_v63 = vrot.slane %v2390_v29, %v771_v62 }
 0x5b2   :  { %1996 = vmatprep.mubr.msk.bf16.mxu1 %vm2267_vm0, %v2266_v1 }
 0x609   :  { %v479_v0 = vpop.xlane.xlu0 %478 }
 0x60a   :  { %2182 = vrcp.f32 %v479_v0 }
 0x60d   :  { %v482_v2 = vpop.xlane.xlu0 %481 }
 0x60e   :  { %2184 = vrcp.f32 %v482_v2 }
 0x611   :  { %v485_v3 = vpop.xlane.xlu0 %484 }
 0x612   :  { %2186 = vrcp.f32 %v485_v3 }
 0x615   :  { %v591_v4 = vpop.permute.xlu0 %590 }
 0x616   :  { %v596_v5 = vsel %vm503_vm6, %v591_v4, 0 }
 0x617   :  { %v2183_v6 = vpop.eup %2182  ;;  %1995 = vmatpush3.bf16.msra.mxu1 %v596_v5 }
 0x618   :  { %v491_v7 = vmul.f32 %v2183_v6, %v2175_v53  ;;  %2006 = vmatprep.subr.bf16.mxu1 %v2266_v1  ;;  %v2155_v6 = vld [vmem:[%s2702_s7 + $0x10] sm:$0xff]  }
 0x61a   :  { %v495_v9 = vpack.c.bf16 %v491_v7, %v491_v7  ;;  %v2156_v7 = vld [vmem:[%s2702_s7 + $0x8] sm:$0xff]  }
 0x61b   :  { %v2185_v10 = vpop.eup %2184 }
 0x61c   :  { %1991 = vmatmul.mubr.msk.bf16.vlgmr.msra.gmra.mxu0 %vm259_vm4, %v495_v9  ;;  %v492_v11 = vmul.f32 %v2185_v10, %v2177_v55  ;;  %v2157_v9 = vld [vmem:[%s2702_s7] sm:$0xff]  }
 0x61d   :  { %2001 = vmatpush3.bf16.msra.mxu0 %v596_v5  ;;  %2002 = vmatprep.mubr.msk.bf16.mxu0 %vm2267_vm0, %v2266_v1  ;;  %v2154_v5 = vld [vmem:[%s2702_s7 + $0x18] sm:$0xff]  }
 0x61e   :  { %v496_v12 = vpack.c.bf16 %v492_v11, %v492_v11  ;;  %2014 = vmatprep.subr.bf16.mxu0 %v2266_v1 }
 0x61f   :  { %v2187_v13 = vpop.eup %2186 }
 0x620   :  { %1997 = vmatmul.mubr.msk.bf16.vlgmr.msra.gmra.mxu1 %vm259_vm4, %v496_v12  ;;  %v493_v14 = vmul.f32 %v2187_v13, %v2179_v57  ;;  %v2152_v57 = vld [vmem:[%s2701_s6 + $0x8] sm:$0xff]  }
 0x621   :  { %2010 = vmatprep.mubr.msk.bf16.mxu1 %vm2267_vm0, %v2266_v1  ;;  %2007 = vmatpush3.bf16.msra.mxu1 %v2150_v21 }
 0x622   :  { %v497_v16 = vpack.c.bf16 %v493_v14, %v493_v14  ;;  %2008 = vmatprep.subr.bf16.mxu1 %v2266_v1 }
 0x624   :  { %2003 = vmatmul.mubr.msk.bf16.vlgmr.msra.gmra.mxu0 %vm259_vm4, %v497_v16 }
 0x625   :  { %2018 = vmatprep.mubr.msk.bf16.mxu0 %vm2267_vm0, %v2266_v1  ;;  %2009 = vmatpush3.bf16.msra.mxu1 %v2151_v22 }
 0x626   :  { %2022 = vmatprep.subr.bf16.mxu1 %v2266_v1  ;;  %2015 = vmatpush3.bf16.msra.mxu0 %v2152_v57 }
 0x627   :  { %2016 = vmatprep.subr.bf16.mxu0 %v2266_v1 }
 0x62a   :  { %2017 = vmatpush3.bf16.msra.mxu0 %v2153_v58 }
 0x62b   :  { %2034 = vmatprep.subr.bf16.mxu0 %v2266_v1 }
 0x671   :  { %v541_v17 = vpop.f32.mrf.mxu1 }
 0x673   :  { %v1986_v18 = vpop.f32.mrf.mxu1 }
 0x675   :  { %v544_v19 = vpop.f32.mrf.mxu1 }
 0x677   :  { %v1987_v20 = vpop.f32.mrf.mxu1 }
 0x6dc   :  { %v584_v24 = vpop.f32.mrf.mxu0 }
 0x6dd   :  { %682 = vrot.lane.b32.xlu1 %v584_v24, %s2275_s17 }
 0x6de   :  { %v1992_v25 = vpop.f32.mrf.mxu0 }
 0x6e0   :  { %v587_v26 = vpop.f32.mrf.mxu0  ;;  %v632_v28 = vpop.f32.mrf.mxu1 }
 0x6e1   :  { %686 = vrot.lane.b32.xlu1 %v632_v28, %s2276_s18 }
 0x6e2   :  { %v1993_v30 = vpop.f32.mrf.mxu0  ;;  %v1998_v31 = vpop.f32.mrf.mxu1 }
 0x6e4   :  { %v635_v32 = vpop.f32.mrf.mxu1  ;;  %v675_v33 = vpop.f32.mrf.mxu0 }
 0x6e5   :  { %690 = vrot.lane.b32.xlu1 %v675_v33, %s2277_s0 }
 0x6e6   :  { %v1999_v34 = vpop.f32.mrf.mxu1  ;;  %v2004_v35 = vpop.f32.mrf.mxu0 }
 0x6e8   :  { %v678_v39 = vpop.f32.mrf.mxu0 }
 0x6e9   :  { %v2158_v39 = vld [vmem:[%s2699_s4 + $0x18] sm:$0xff]  }
 0x6ea   :  { %v2005_v41 = vpop.f32.mrf.mxu0 }
 0x6eb   :  { %v2159_v41 = vld [vmem:[%s2699_s4 + $0x10] sm:$0xff]  }
 0x74f   :  { %v683_v42 = vpop.permute.xlu1 %682 }
 0x750   :  { %v693_v44 = vsel %vm259_vm4, %v541_v17, %v683_v42 }
 0x753   :  { %v687_v43 = vpop.permute.xlu1 %686 }
 0x754   :  { %v695_v45 = vsel %vm694_vm7, %v693_v44, %v687_v43 }
 0x757   :  { %v691_v46 = vpop.permute.xlu1 %690 }
 0x758   :  { %v697_v38 = vsel %vm696_vm8, %v695_v45, %v691_v46  ;;  %v934_v45 = vsub.s32 1, %v2388_v27 }
 0x759   :  { %v698_v47 = vpack.c.bf16 %v697_v38, %v697_v38 }
 0x75a   :  { %v935_v46 = vrot.slane %v2390_v29, %v934_v45 }
 0x75b   :  { %2011 = vmatmul.mubr.msk.bf16.vlgmr.msra.gmra.mxu1 %vm141_vm3, %v698_v47 }
 0x75c   :  { %2030 = vmatprep.mubr.msk.bf16.mxu1 %vm2267_vm0, %v2266_v1  ;;  %2023 = vmatpush3.bf16.msra.mxu1 %v2154_v5 }
 0x75d   :  { %2024 = vmatprep.subr.bf16.mxu1 %v2266_v1 }
 0x760   :  { %2025 = vmatpush3.bf16.msra.mxu1 %v2155_v6 }
 0x761   :  { %2026 = vmatprep.subr.bf16.mxu1 %v2266_v1 }
 0x764   :  { %2027 = vmatpush3.bf16.msra.mxu1 %v2156_v7 }
 0x765   :  { %2028 = vmatprep.subr.bf16.mxu1 %v2266_v1 }
 0x768   :  { %2029 = vmatpush3.bf16.msra.mxu1 %v2157_v9 }
 0x769   :  { %2048 = vmatprep.subr.bf16.mxu1 %v2266_v1 }
 0x81b   :  { %v752_v48 = vpop.f32.mrf.mxu1 }
 0x81c   :  { %v758_v49 = vadd.f32 %v752_v48, %v2364_v15 }
 0x81d   :  { %v2012_v50 = vpop.f32.mrf.mxu1 }
 0x81e   :  { %v759_v51 = vpack.c.bf16 %v758_v49, %v758_v49 }
 0x81f   :  { %v755_v52 = vpop.f32.mrf.mxu1 }
 0x820   :  { %v760_v53 = vunpack.c.l.bf16 %v759_v51 }
 0x821   :  { %v2013_v54 = vpop.f32.mrf.mxu1 }
 0x822   :  { %v761_v55 = vmul.f32 %v760_v53, %v760_v53 }
 0x824   :  { %v762_v56 = vsel %vm141_vm3, %v761_v55, 0.0 }
 0x825   :  { %763 = vadd.xlane.f32.xlu1 %v762_v56 }
 0x8ae   :  { %v764_v15 = vpop.xlane.xlu1 %763 }
 0x8af   :  { %v765_v59 = vmul.f32 0.03125, %v764_v15 }
 0x8b1   :  { %v766_v60 = vadd.f32 1e-05, %v765_v59 }
 0x8b3   :  { %2188 = vrsqrt.f32 %v766_v60 }
 0x8c0   :  { %v2189_v0 = vpop.eup %2188 }
 0x8c1   :  { %v768_v2 = vmul.f32 %v2189_v0, %v760_v53 }
 0x8c3   :  { %v773_v3 = vmul.f32 %v772_v63, %v768_v2 }
 0x8c5   :  { %v774_v4 = vpack.c.bf16 %v773_v3, %v773_v3 }
 0x8c7   :  { %2019 = vmatmul.mubr.msk.bf16.vlgmr.msra.gmra.mxu0 %vm141_vm3, %v774_v4 }
 0x8c8   :  { %2038 = vmatprep.mubr.msk.bf16.mxu0 %vm2267_vm0, %v2266_v1  ;;  %2035 = vmatpush3.bf16.msra.mxu0 %v2158_v39 }
 0x8c9   :  { %2036 = vmatprep.subr.bf16.mxu0 %v2266_v1 }
 0x8cc   :  { %2037 = vmatpush3.bf16.msra.mxu0 %v2159_v41 }
 0x8cd   :  { %2042 = vmatprep.subr.bf16.mxu0 %v2266_v1 }
 0x987   :  { %v828_v10 = vpop.f32.mrf.mxu0 }
 0x988   :  { %841 = vrot.lane.b32.xlu0 %v828_v10, %s2270_s10  ;;  %v834_v14 = vsub.f32 0.0, %v828_v10 }
 0x989   :  { %v2020_v11 = vpop.f32.mrf.mxu0 }
 0x98a   :  { %v835_v16 = vmul.f32 1.442695, %v834_v14 }
 0x98b   :  { %v831_v12 = vpop.f32.mrf.mxu0 }
 0x98c   :  { %2190 = vpow2.f32 %v835_v16 }
 0x98d   :  { %v2021_v13 = vpop.f32.mrf.mxu0 }
 0x999   :  { %v2191_v17 = vpop.eup %2190 }
 0x99a   :  { %v837_v18 = vadd.f32 1.0, %v2191_v17 }
 0x99c   :  { %2192 = vrcp.f32 %v837_v18 }
 0x9a9   :  { %v2193_v19 = vpop.eup %2192 }
 0x9aa   :  { %v839_v20 = vmul.f32 %v2193_v19, %v828_v10 }
 0x9fa   :  { %v842_v21 = vpop.permute.xlu0 %841 }
 0x9fb   :  { %v844_v22 = vmul.f32 %v842_v21, %v839_v20 }
 0x9fd   :  { %v845_v24 = vpack.c.bf16 %v844_v22, %v844_v22 }
 0x9ff   :  { %2031 = vmatmul.mubr.msk.bf16.vlgmr.msra.gmra.mxu1 %vm87_vm2, %v845_v24 }
 0xa00   :  { %2050 = vmatprep.mubr.msk.bf16.mxu1 %vm2267_vm0, %v2266_v1 }
 0xabf   :  { %v915_v25 = vpop.f32.mrf.mxu1 }
 0xac0   :  { %v921_v26 = vadd.f32 %v915_v25, %v760_v53 }
 0xac1   :  { %v2032_v28 = vpop.f32.mrf.mxu1 }
 0xac2   :  { %v922_v30 = vpack.c.bf16 %v921_v26, %v921_v26 }
 0xac3   :  { %v918_v31 = vpop.f32.mrf.mxu1 }
 0xac4   :  { %v2537_v32 = vunpack.c.l.bf16 %v922_v30 }
 0xac5   :  { %v2033_v33 = vpop.f32.mrf.mxu1 }
 0xac6   :  { %v924_v34 = vmul.f32 %v2537_v32, %v2537_v32 }
 0xac8   :  { %v925_v35 = vsel %vm141_vm3, %v924_v34, 0.0 }
 0xac9   :  { %926 = vadd.xlane.f32.xlu0 %v925_v35 }
 0xb52   :  { %v927_v42 = vpop.xlane.xlu0 %926 }
 0xb53   :  { %v928_v43 = vmul.f32 0.03125, %v927_v42 }
 0xb55   :  { %v929_v44 = vadd.f32 1e-05, %v928_v43 }
 0xb57   :  { %2194 = vrsqrt.f32 %v929_v44 }
 0xb64   :  { %v2195_v38 = vpop.eup %2194 }
 0xb65   :  { %v931_v47 = vmul.f32 %v2195_v38, %v2537_v32 }
 0xb67   :  { %v936_v48 = vmul.f32 %v935_v46, %v931_v47 }
 0xb69   :  { %v937_v49 = vpack.c.bf16 %v936_v48, %v936_v48 }
 0xb6b   :  { %2039 = vmatmul.mubr.msk.bf16.vlgmr.msra.gmra.mxu0 %vm141_vm3, %v937_v49 }
 0xb6c   :  { %2044 = vmatprep.mubr.msk.bf16.mxu0 %vm2267_vm0, %v2266_v1 }
 0xc2b   :  { %v2556_v50 = vpop.f32.mrf.mxu0 }
 0xc2c   :  { %v1007_v51 = vmul.f32 %v2556_v50, %v2398_v36  ;;  %v999_v52 = vmul.f32 %v2556_v50, %v2406_v40  ;;  %v1006_v56 = vmul.f32 %v2556_v50, %v2400_v37  ;;  %v998_v57 = vmul.f32 %v2556_v50, %v2384_v23 }
 0xc2d   :  { %v2040_v53 = vpop.f32.mrf.mxu0  ;;  %v1014_v43 = vpack.c.bf16 %v2556_v50, %v2556_v50 }
 0xc2e   :  { %1009 = vrot.lane.b32.xlu1 %v1007_v51, %s2270_s10  ;;  %1001 = vrot.lane.b32.xlu0 %v999_v52, %s2270_s10 }
 0xc2f   :  { %v995_v54 = vpop.f32.mrf.mxu0 }
 0xc31   :  { %v2041_v55 = vpop.f32.mrf.mxu0 }
 0xca0   :  { %v1010_v58 = vpop.permute.xlu1 %1009  ;;  %v1002_v15 = vpop.permute.xlu0 %1001 }
 0xca1   :  { %v1012_v59 = vadd.f32 %v1010_v58, %v1006_v56  ;;  %v1004_v36 = vadd.f32 %v1002_v15, %v998_v57 }
 0xca3   :  { %v1013_v60 = vpack.c.bf16 %v1012_v59, %v1012_v59  ;;  %v1005_v62 = vpack.c.bf16 %v1004_v36, %v1004_v36 }
 0xca5   :  { %1023 = vrot.lane.b32.xlu1 %v1013_v60, %s2271_s3  ;;  %1018 = vrot.lane.b32.xlu0 %v1005_v62, %s2272_s11 }
 0xca9   :  { %1028 = vrot.lane.b32.xlu1 %v1013_v60, %s2268_s27 }
 0xd17   :  { %v1024_v40 = vpop.permute.xlu1 %1023  ;;  %v1019_v3 = vpop.permute.xlu0 %1018 }
 0xd18   :  { %1119 = vrot.lane.b32.xlu1 %v1024_v40, %s2268_s27 }
 0xd1b   :  { %v1029_v63 = vpop.permute.xlu1 %1028 }
 0xd1c   :  { %v1034_v37 = vsel %vm259_vm4, %v1029_v63, 0  ;;  %1016 = vrot.lane.b32.xlu1 %v1005_v62, %s2271_s3 }
 0xd1d   :  { %2043 = vmatpush3.bf16.xpose.msra.mxu0 %v1034_v37  ;;  %2049 = vmatpush3.bf16.xpose.msra.mxu1 %v1034_v37 }
 0xd1e   :  { %2054 = vmatprep.subr.bf16.mxu0 %v2266_v1  ;;  %2060 = vmatprep.subr.bf16.mxu1 %v2266_v1 }
 0xd20   :  { %1020 = vrot.lane.b32.xlu1 %v1005_v62, %s2273_s12 }
 0xd24   :  { %2045 = vmatmul.mubr.msk.bf16.vlgmr.msra.gmra.mxu0 %vm259_vm4, %v1005_v62 }
 0xd25   :  { %2056 = vmatprep.mubr.msk.bf16.mxu0 %vm2267_vm0, %v2266_v1 }
 0xd8a   :  { %v1120_v23 = vpop.permute.xlu1 %1119 }
 0xd8b   :  { %v1125_v0 = vsel %vm259_vm4, %v1120_v23, 0 }
 0xd8c   :  { %2055 = vmatpush3.bf16.xpose.msra.mxu0 %v1125_v0 }
 0xd8d   :  { %2066 = vmatprep.subr.bf16.mxu0 %v2266_v1 }
 0xd8e   :  { %v1017_v2 = vpop.permute.xlu1 %1016 }
 0xd8f   :  { %2051 = vmatmul.mubr.msk.bf16.vlgmr.msra.gmra.mxu1 %vm259_vm4, %v1017_v2 }
 0xd90   :  { %2061 = vmatpush3.bf16.xpose.msra.mxu1 %v1125_v0  ;;  %2062 = vmatprep.mubr.msk.bf16.mxu1 %vm2267_vm0, %v2266_v1 }
 0xd91   :  { %2072 = vmatprep.subr.bf16.mxu1 %v2266_v1 }
 0xd92   :  { %v1021_v4 = vpop.permute.xlu1 %1020 }
 0xd93   :  { %2057 = vmatmul.mubr.msk.bf16.vlgmr.msra.gmra.mxu0 %vm259_vm4, %v1019_v3 }
 0xd94   :  { %2068 = vmatprep.mubr.msk.bf16.mxu0 %vm2267_vm0, %v2266_v1 }
 0xd97   :  { %2063 = vmatmul.mubr.msk.bf16.vlgmr.msra.gmra.mxu1 %vm259_vm4, %v1021_v4 }
 0xd98   :  { %2074 = vmatprep.mubr.msk.bf16.mxu1 %vm2267_vm0, %v2266_v1 }
 0xde4   :  { %v1070_v5 = vpop.f32.mrf.mxu0 }
 0xde5   :  { %v1210_v6 = vmul.f32 0.35355338, %v1070_v5 }
 0xde6   :  { %v2046_v7 = vpop.f32.mrf.mxu0 }
 0xde7   :  { %v1214_v9 = vsel %vm2442_vm5, %v1210_v6, -inf }
 0xde8   :  { %v1073_v10 = vpop.f32.mrf.mxu0  ;;  %v1218_v11 = vsel %vm259_vm4, %v1214_v9, -inf }
 0xde9   :  { %1219 = vmax.xlane.f32.xlu0 %v1218_v11 }
 0xdea   :  { %v2047_v12 = vpop.f32.mrf.mxu0 }
 0xe4f   :  { %v1113_v13 = vpop.f32.mrf.mxu1 }
 0xe50   :  { %v1211_v14 = vmul.f32 0.35355338, %v1113_v13 }
 0xe51   :  { %v2052_v16 = vpop.f32.mrf.mxu1 }
 0xe52   :  { %v1215_v17 = vsel %vm2442_vm5, %v1211_v14, -inf }
 0xe53   :  { %v1116_v18 = vpop.f32.mrf.mxu1  ;;  %v1161_v19 = vpop.f32.mrf.mxu0  ;;  %v1221_v20 = vsel %vm259_vm4, %v1215_v17, -inf }
 0xe54   :  { %v1212_v21 = vmul.f32 0.35355338, %v1161_v19  ;;  %1222 = vmax.xlane.f32.xlu1 %v1221_v20  ;;  %v2160_v18 = vld [vmem:[%s2700_s5 + $0x18] sm:$0xff]   ;;  %v2161_v19 = vld [vmem:[%s2700_s5 + $0x10] sm:$0xff]  }
 0xe55   :  { %v2053_v22 = vpop.f32.mrf.mxu1  ;;  %v2058_v24 = vpop.f32.mrf.mxu0 }
 0xe56   :  { %v1216_v25 = vsel %vm2442_vm5, %v1212_v21, -inf }
 0xe57   :  { %v1164_v26 = vpop.f32.mrf.mxu0  ;;  %v1204_v28 = vpop.f32.mrf.mxu1  ;;  %v1224_v30 = vsel %vm259_vm4, %v1216_v25, -inf }
 0xe58   :  { %v1213_v31 = vmul.f32 0.35355338, %v1204_v28  ;;  %1225 = vmax.xlane.f32.xlu0 %v1224_v30 }
 0xe59   :  { %v2059_v33 = vpop.f32.mrf.mxu0  ;;  %v2064_v34 = vpop.f32.mrf.mxu1 }
 0xe5a   :  { %v1217_v35 = vsel %vm2442_vm5, %v1213_v31, -inf }
 0xe5b   :  { %v1207_v39 = vpop.f32.mrf.mxu1  ;;  %v1227_v41 = vsel %vm259_vm4, %v1217_v35, -inf }
 0xe5c   :  { %1228 = vmax.xlane.f32.xlu0 %v1227_v41 }
 0xe5d   :  { %v2065_v42 = vpop.f32.mrf.mxu1 }
 0xe72   :  { %v1220_v44 = vpop.xlane.xlu0 %1219  ;;  %1026 = vrot.lane.b32.xlu0 %v1014_v43, %s2271_s3 }
 0xe73   :  { %v1230_v45 = vsub.f32 %v1214_v9, %v1220_v44 }
 0xe75   :  { %v1234_v46 = vmul.f32 1.442695, %v1230_v45 }
 0xe77   :  { %2196 = vpow2.f32 %v1234_v46 }
 0xe84   :  { %v2197_v38 = vpop.eup %2196 }
 0xe85   :  { %v1242_v47 = vsel %vm259_vm4, %v2197_v38, 0.0 }
 0xe86   :  { %1243 = vadd.xlane.f32.xlu1 %v1242_v47 }
 0xedd   :  { %v1223_v61 = vpop.xlane.xlu1 %1222 }
 0xede   :  { %v1231_v48 = vsub.f32 %v1215_v17, %v1223_v61 }
 0xee0   :  { %v1236_v49 = vmul.f32 1.442695, %v1231_v48 }
 0xee1   :  { %v1226_v51 = vpop.xlane.xlu0 %1225 }
 0xee2   :  { %2198 = vpow2.f32 %v1236_v49  ;;  %v1232_v52 = vsub.f32 %v1216_v25, %v1226_v51 }
 0xee4   :  { %v1238_v53 = vmul.f32 1.442695, %v1232_v52 }
 0xee5   :  { %v1229_v54 = vpop.xlane.xlu0 %1228 }
 0xee6   :  { %2200 = vpow2.f32 %v1238_v53  ;;  %v1233_v50 = vsub.f32 %v1217_v35, %v1229_v54 }
 0xee8   :  { %v1240_v55 = vmul.f32 1.442695, %v1233_v50 }
 0xee9   :  { %v1027_v56 = vpop.permute.xlu0 %1026 }
 0xeea   :  { %2202 = vpow2.f32 %v1240_v55  ;;  %1357 = vrot.lane.b32.xlu0 %v1027_v56, %s2274_s13 }
 0xeef   :  { %v2199_v57 = vpop.eup %2198 }
 0xef0   :  { %v1245_v58 = vsel %vm259_vm4, %v2199_v57, 0.0 }
 0xef1   :  { %1246 = vadd.xlane.f32.xlu1 %v1245_v58  ;;  %v2162_v58 = vld [vmem:[%s2701_s6 + $0x18] sm:$0xff]  }
 0xef3   :  { %v2201_v15 = vpop.eup %2200 }
 0xef4   :  { %v1248_v59 = vsel %vm259_vm4, %v2201_v15, 0.0 }
 0xef5   :  { %1249 = vadd.xlane.f32.xlu1 %v1248_v59 }
 0xef7   :  { %v2203_v36 = vpop.eup %2202 }
 0xef8   :  { %v1251_v60 = vsel %vm259_vm4, %v2203_v36, 0.0 }
 0xef9   :  { %1252 = vadd.xlane.f32.xlu1 %v1251_v60  ;;  %v1537_v60 = vsub.s32 3, %v2388_v27 }
 0xf0a   :  { %1266 = vrot.lane.b32.xlu1 %v1014_v43, %s2274_s13 }
 0xf0f   :  { %v1244_v62 = vpop.xlane.xlu1 %1243 }
 0xf10   :  { %2204 = vrcp.f32 %v1244_v62  ;;  %v1538_v62 = vrot.slane %v2390_v29, %v1537_v60 }
 0xf1d   :  { %v2205_v37 = vpop.eup %2204 }
 0xf1e   :  { %v1258_v0 = vmul.f32 %v2205_v37, %v2197_v38 }
 0xf20   :  { %v1262_v6 = vpack.c.bf16 %v1258_v0, %v1258_v0  ;;  %v2164_v0 = vld [vmem:[%s2702_s7 + $0x38] sm:$0xff]  }
 0xf5c   :  { %v1358_v5 = vpop.permute.xlu0 %1357 }
 0xf5d   :  { %v1363_v9 = vsel %vm503_vm6, %v1358_v5, 0 }
 0xf7a   :  { %v1247_v40 = vpop.xlane.xlu1 %1246 }
 0xf7b   :  { %2206 = vrcp.f32 %v1247_v40 }
 0xf7e   :  { %v1250_v63 = vpop.xlane.xlu1 %1249 }
 0xf7f   :  { %2208 = vrcp.f32 %v1250_v63 }
 0xf82   :  { %v1253_v23 = vpop.xlane.xlu1 %1252 }
 0xf83   :  { %2210 = vrcp.f32 %v1253_v23 }
 0xf86   :  { %v1267_v2 = vpop.permute.xlu1 %1266 }
 0xf87   :  { %v1272_v3 = vsel %vm503_vm6, %v1267_v2, 0  ;;  %v2165_v2 = vld [vmem:[%s2702_s7 + $0x30] sm:$0xff]  }
 0xf88   :  { %v2207_v4 = vpop.eup %2206  ;;  %2067 = vmatpush3.bf16.msra.mxu0 %v1272_v3  ;;  %2073 = vmatpush3.bf16.msra.mxu1 %v1272_v3  ;;  %v2166_v3 = vld [vmem:[%s2702_s7 + $0x28] sm:$0xff]  }
 0xf89   :  { %2078 = vmatprep.subr.bf16.mxu0 %v2266_v1  ;;  %2084 = vmatprep.subr.bf16.mxu1 %v2266_v1  ;;  %v1259_v7 = vmul.f32 %v2207_v4, %v2199_v57  ;;  %v2167_v4 = vld [vmem:[%s2702_s7 + $0x20] sm:$0xff]  }
 0xf8b   :  { %2069 = vmatmul.mubr.msk.bf16.vlgmr.msra.gmra.mxu0 %vm259_vm4, %v1262_v6  ;;  %v1263_v10 = vpack.c.bf16 %v1259_v7, %v1259_v7 }
 0xf8c   :  { %v2209_v11 = vpop.eup %2208  ;;  %2079 = vmatpush3.bf16.msra.mxu0 %v1363_v9  ;;  %2080 = vmatprep.mubr.msk.bf16.mxu0 %vm2267_vm0, %v2266_v1 }
 0xf8d   :  { %2075 = vmatmul.mubr.msk.bf16.vlgmr.msra.gmra.mxu1 %vm259_vm4, %v1263_v10  ;;  %v1260_v12 = vmul.f32 %v2209_v11, %v2201_v15  ;;  %2090 = vmatprep.subr.bf16.mxu0 %v2266_v1  ;;  %v2163_v15 = vld [vmem:[%s2701_s6 + $0x10] sm:$0xff]  }
 0xf8e   :  { %2085 = vmatpush3.bf16.msra.mxu1 %v1363_v9  ;;  %2086 = vmatprep.mubr.msk.bf16.mxu1 %vm2267_vm0, %v2266_v1 }
 0xf8f   :  { %2098 = vmatprep.subr.bf16.mxu1 %v2266_v1  ;;  %v1264_v14 = vpack.c.bf16 %v1260_v12, %v1260_v12 }
 0xf90   :  { %v2211_v13 = vpop.eup %2210 }
 0xf91   :  { %v1261_v16 = vmul.f32 %v2211_v13, %v2203_v36 }
 0xf93   :  { %2081 = vmatmul.mubr.msk.bf16.vlgmr.msra.gmra.mxu0 %vm259_vm4, %v1264_v14  ;;  %v1265_v17 = vpack.c.bf16 %v1261_v16, %v1261_v16 }
 0xf94   :  { %2094 = vmatprep.mubr.msk.bf16.mxu0 %vm2267_vm0, %v2266_v1  ;;  %2091 = vmatpush3.bf16.msra.mxu0 %v2160_v18 }
 0xf95   :  { %2087 = vmatmul.mubr.msk.bf16.vlgmr.msra.gmra.mxu1 %vm259_vm4, %v1265_v17  ;;  %2092 = vmatprep.subr.bf16.mxu0 %v2266_v1 }
 0xf96   :  { %2102 = vmatprep.mubr.msk.bf16.mxu1 %vm2267_vm0, %v2266_v1  ;;  %2099 = vmatpush3.bf16.msra.mxu1 %v2162_v58 }
 0xf97   :  { %2100 = vmatprep.subr.bf16.mxu1 %v2266_v1 }
 0xf98   :  { %2093 = vmatpush3.bf16.msra.mxu0 %v2161_v19 }
 0xf99   :  { %2106 = vmatprep.subr.bf16.mxu0 %v2266_v1 }
 0xf9a   :  { %2101 = vmatpush3.bf16.msra.mxu1 %v2163_v15 }
 0xf9b   :  { %2118 = vmatprep.subr.bf16.mxu1 %v2266_v1 }
0x104b   :  { %v1308_v20 = vpop.f32.mrf.mxu0 }
0x104d   :  { %v2070_v21 = vpop.f32.mrf.mxu0  ;;  %v1351_v22 = vpop.f32.mrf.mxu1 }
0x104e   :  { %1449 = vrot.lane.b32.xlu0 %v1351_v22, %s2275_s17 }
0x104f   :  { %v1311_v24 = vpop.f32.mrf.mxu0  ;;  %v2076_v25 = vpop.f32.mrf.mxu1 }
0x1051   :  { %v2071_v26 = vpop.f32.mrf.mxu0  ;;  %v1354_v28 = vpop.f32.mrf.mxu1 }
0x1053   :  { %v2077_v30 = vpop.f32.mrf.mxu1  ;;  %v1399_v31 = vpop.f32.mrf.mxu0 }
0x1054   :  { %1453 = vrot.lane.b32.xlu0 %v1399_v31, %s2276_s18 }
0x1055   :  { %v2082_v33 = vpop.f32.mrf.mxu0  ;;  %v1442_v34 = vpop.f32.mrf.mxu1 }
0x1056   :  { %1457 = vrot.lane.b32.xlu1 %v1442_v34, %s2277_s0  ;;  %v2168_v33 = vld [vmem:[%s2703_s8 + $0x8] sm:$0xff]   ;;  %v2169_v34 = vld [vmem:[%s2703_s8] sm:$0xff]   ;;  %s2278_s8 = smov [#allocation5]  }
0x1057   :  { %v1402_v35 = vpop.f32.mrf.mxu0  ;;  %v2088_v39 = vpop.f32.mrf.mxu1  ;;  %s1788_s25 = sshll.u32 %s2278_s8, 4  ;;  %s1789_s25 = int_to_ptr.vmem [resolvable:$true] %s1788_s25 }
0x1058   :  { %s2240_s26 = scalar_lea.vmem %s1789_s25, 16  ;;  %s2244_s28 = scalar_lea.vmem %s1789_s25, 32 }
0x1059   :  { %v2083_v41 = vpop.f32.mrf.mxu0  ;;  %v1445_v42 = vpop.f32.mrf.mxu1  ;;  %p2241_p5 = scmp.ne.s32.totalorder %s1789_s25, %s2240_s26  ;;  %p2245_p6 = scmp.lt.s32.totalorder %s1789_s25, %s1789_s25 }
0x105a   :  { %v1702_v42 = vsub.s32 4, %v2388_v27  ;;  %p2246_p7 = scmp.lt.s32.totalorder %s2244_s28, %s2240_s26 }
0x105b   :  { %v2089_v43 = vpop.f32.mrf.mxu1 }
0x105c   :  { %v1703_v43 = vrot.slane %v2390_v29, %v1702_v42  ;;  %p2247_p8 = por %p2246_p7, %p2245_p6 }
0x105e   :  { %p2248_p9 = pnand %p2247_p8, %p2241_p5 }
0x10c0   :  { %v1450_v44 = vpop.permute.xlu0 %1449 }
0x10c1   :  { %v1460_v45 = vsel %vm259_vm4, %v1308_v20, %v1450_v44 }
0x10c6   :  { %v1454_v46 = vpop.permute.xlu0 %1453 }
0x10c7   :  { %v1461_v38 = vsel %vm694_vm7, %v1460_v45, %v1454_v46 }
0x10c8   :  { %v1458_v47 = vpop.permute.xlu1 %1457 }
0x10c9   :  { %v1462_v61 = vsel %vm696_vm8, %v1461_v38, %v1458_v47 }
0x10ca   :  { %v1463_v48 = vpack.c.bf16 %v1462_v61, %v1462_v61 }
0x10cc   :  { %2095 = vmatmul.mubr.msk.bf16.vlgmr.msra.gmra.mxu0 %vm141_vm3, %v1463_v48 }
0x10cd   :  { %2114 = vmatprep.mubr.msk.bf16.mxu0 %vm2267_vm0, %v2266_v1  ;;  %2107 = vmatpush3.bf16.msra.mxu0 %v2164_v0 }
0x10ce   :  { %2108 = vmatprep.subr.bf16.mxu0 %v2266_v1 }
0x10d1   :  { %2109 = vmatpush3.bf16.msra.mxu0 %v2165_v2 }
0x10d2   :  { %2110 = vmatprep.subr.bf16.mxu0 %v2266_v1 }
0x10d5   :  { %2111 = vmatpush3.bf16.msra.mxu0 %v2166_v3 }
0x10d6   :  { %2112 = vmatprep.subr.bf16.mxu0 %v2266_v1 }
0x10d9   :  { %2113 = vmatpush3.bf16.msra.mxu0 %v2167_v4 }
0x118c   :  { %v1518_v49 = vpop.f32.mrf.mxu0 }
0x118d   :  { %v1524_v51 = vadd.f32 %v1518_v49, %v2537_v32 }
0x118e   :  { %v2096_v52 = vpop.f32.mrf.mxu0 }
0x118f   :  { %v1525_v53 = vpack.c.bf16 %v1524_v51, %v1524_v51 }
0x1190   :  { %v1521_v54 = vpop.f32.mrf.mxu0 }
0x1191   :  { %v1526_v50 = vunpack.c.l.bf16 %v1525_v53  ;;  %v1773_v53 = vcvt.s32.f32 %v2357_v8 }
0x1192   :  { %v2097_v55 = vpop.f32.mrf.mxu0 }
0x1193   :  { %v1527_v56 = vmul.f32 %v1526_v50, %v1526_v50 }
0x1195   :  { %v1528_v57 = vsel %vm141_vm3, %v1527_v56, 0.0 }
0x1196   :  { %1529 = vadd.xlane.f32.xlu0 %v1528_v57 }
0x121f   :  { %v1530_v32 = vpop.xlane.xlu0 %1529 }
0x1220   :  { %v1531_v59 = vmul.f32 0.03125, %v1530_v32 }
0x1222   :  { %v1532_v36 = vadd.f32 1e-05, %v1531_v59 }
0x1224   :  { %2212 = vrsqrt.f32 %v1532_v36 }
0x1231   :  { %v2213_v40 = vpop.eup %2212 }
0x1232   :  { %v1534_v63 = vmul.f32 %v2213_v40, %v1526_v50 }
0x1234   :  { %v1539_v37 = vmul.f32 %v1538_v62, %v1534_v63 }
0x1236   :  { %v1540_v23 = vpack.c.bf16 %v1539_v37, %v1539_v37 }
0x1238   :  { %2103 = vmatmul.mubr.msk.bf16.vlgmr.msra.gmra.mxu1 %vm141_vm3, %v1540_v23 }
0x1239   :  { %2122 = vmatprep.mubr.msk.bf16.mxu1 %vm2267_vm0, %v2266_v1  ;;  %2119 = vmatpush3.bf16.msra.mxu1 %v2168_v33 }
0x123a   :  { %2120 = vmatprep.subr.bf16.mxu1 %v2266_v1 }
0x123d   :  { %2121 = vmatpush3.bf16.msra.mxu1 %v2169_v34 }
0x12f8   :  { %v1595_v5 = vpop.f32.mrf.mxu1 }
0x12f9   :  { %1608 = vrot.lane.b32.xlu1 %v1595_v5, %s2270_s10  ;;  %v1601_v10 = vsub.f32 0.0, %v1595_v5 }
0x12fa   :  { %v2104_v6 = vpop.f32.mrf.mxu1 }
0x12fb   :  { %v1602_v11 = vmul.f32 1.442695, %v1601_v10 }
0x12fc   :  { %v1598_v7 = vpop.f32.mrf.mxu1 }
0x12fd   :  { %2214 = vpow2.f32 %v1602_v11 }
0x12fe   :  { %v2105_v9 = vpop.f32.mrf.mxu1 }
0x130a   :  { %v2215_v12 = vpop.eup %2214 }
0x130b   :  { %v1604_v13 = vadd.f32 1.0, %v2215_v12 }
0x130d   :  { %2216 = vrcp.f32 %v1604_v13 }
0x131a   :  { %v2217_v14 = vpop.eup %2216 }
0x131b   :  { %v1606_v16 = vmul.f32 %v2217_v14, %v1595_v5 }
0x136b   :  { %v1609_v17 = vpop.permute.xlu1 %1608 }
0x136c   :  { %v1611_v18 = vmul.f32 %v1609_v17, %v1606_v16 }
0x136e   :  { %v1612_v19 = vpack.c.bf16 %v1611_v18, %v1611_v18 }
0x1370   :  { %2115 = vmatmul.mubr.msk.bf16.vlgmr.msra.gmra.mxu0 %vm87_vm2, %v1612_v19 }
0x1430   :  { %v1683_v20 = vpop.f32.mrf.mxu0 }
0x1431   :  { %v1689_v21 = vadd.f32 %v1683_v20, %v1526_v50 }
0x1432   :  { %v2116_v22 = vpop.f32.mrf.mxu0 }
0x1433   :  { %v1690_v24 = vpack.c.bf16 %v1689_v21, %v1689_v21 }
0x1434   :  { %v1686_v25 = vpop.f32.mrf.mxu0 }
0x1435   :  { %v1691_v26 = vunpack.c.l.bf16 %v1690_v24 }
0x1436   :  { %v2117_v28 = vpop.f32.mrf.mxu0 }
0x1437   :  { %v1692_v30 = vmul.f32 %v1691_v26, %v1691_v26 }
0x1439   :  { %v1693_v31 = vsel %vm141_vm3, %v1692_v30, 0.0 }
0x143a   :  { %1694 = vadd.xlane.f32.xlu1 %v1693_v31 }
0x14c3   :  { %v1695_v35 = vpop.xlane.xlu1 %1694 }
0x14c4   :  { %v1696_v39 = vmul.f32 0.03125, %v1695_v35 }
0x14c6   :  { %v1697_v41 = vadd.f32 1e-05, %v1696_v39 }
0x14c8   :  { %2218 = vrsqrt.f32 %v1697_v41 }
0x14d5   :  { %v2219_v44 = vpop.eup %2218 }
0x14d6   :  { %v1699_v45 = vmul.f32 %v2219_v44, %v1691_v26 }
0x14d8   :  { %v1704_v46 = vmul.f32 %v1703_v43, %v1699_v45 }
0x14da   :  { %v1705_v38 = vpack.c.bf16 %v1704_v46, %v1704_v46 }
0x14dc   :  { %v1711_v47 = vshrl.u32 %v1705_v38, 16 }
0x14de   :  { %v1713_v61 = vrot.slane %v1711_v47, 3 }
0x14e0   :  { %2123 = vmatmul.mubr.msk.bf16.vlgmr.msra.gmra.mxu1 %vm141_vm3, %v1713_v61 }
0x15a0   :  { %v1763_v48 = vpop.f32.mrf.mxu1 }
0x15a1   :  { %v1770_v1 = vsel %vm1769_vm9, %v1763_v48, -inf }
0x15a2   :  { %1771 = vmax.xlane.f32.xlu0 %v1770_v1  ;;  %v2124_v49 = vpop.f32.mrf.mxu1 }
0x15a4   :  { %v1766_v51 = vpop.f32.mrf.mxu1 }
0x15a6   :  { %v2125_v52 = vpop.f32.mrf.mxu1 }
0x162b   :  { %v1772_v27 = vpop.xlane.xlu0 %1771 }
0x162c   :  { %vm1774_vm10 = vcmp.eq.f32.partialorder %v1763_v48, %v1772_v27 }
0x162d   :  { %v1775_v29 = vsel %vm1774_vm10, %v1773_v53, 64.0 }
0x162e   :  { %v1776_v54 = vsel %vm1769_vm9, %v1775_v29, inf }
0x162f   :  { %1777 = vmin.xlane.f32.xlu0 %v1776_v54 }
0x16b8   :  { %v1778_v50 = vpop.xlane.xlu0 %1777 }
0x16b9   :  { %v2126_v55 = vtrunc.f32 %v1778_v50 }
0x16bb   :  { %v2127_v56 = vcvt.f32.s32 %v2126_v55 }
0x16bd   :  { %1781 = vst.msk [vmem:[#allocation5] sm:$0x1] %vm1780_vm11, %v2127_v56 }
0x16be   :  { %2251 = shalt.err (!%p2248_p9)
}
0x16bf   :  { %1791 = dma.vmem_to_hbm [thread:$0]  %s1789_s25, 16, %s2704_s9, [#allocation4]  }
0x16c0   :  { %2262 = dma.done.wait [#allocation4], 16  }
0x16c1   :  { %2263 = vsyncadd [#allocation4], 4294967280 }
0x16c2   :  { %1795 = vsyncpa [#allocation3], 1 }
0x16c3   :  { %1796 = vsyncpa [#allocation4], 1 }

</bundles_post_ra>
